<compile_context>
chip_gen: v6e
topology: v6e:2x2x1
jax: 0.10.0
libtpu: 0.0.40
codegen_flags: <defaults>
</compile_context>

<pallas_src>
import math

import jax
import jax.numpy as jnp
from jax import lax
from jax.experimental import pallas as pl
from jax.experimental.pallas import tpu as pltpu


def _make_block_kernel(n_head, n_hidden_chunks, matmul_dtype, approx_recip):
    inv_sqrt2 = 1.0 / math.sqrt(2.0)

    def kernel(x_ref, bias_ref,
               ln1g_ref, ln1b_ref,
               wqkv_ref, bqkv_ref,
               wp_ref, bp_ref,
               ln2g_ref, ln2b_ref,
               w1_ref, b1_ref, w2_ref, b2_ref,
               o_ref):
        x = x_ref[0]                        # (T, C) f32, current batch element
        T, C = x.shape
        D = C // n_head
        eps = 1e-5

        def layernorm(v, g, b):
            mu = jnp.mean(v, axis=-1, keepdims=True)
            var = jnp.mean((v - mu) ** 2, axis=-1, keepdims=True)
            return (v - mu) * lax.rsqrt(var + eps) * g + b

        # ---------------- attention branch ----------------
        h = layernorm(x, ln1g_ref[0], ln1b_ref[0]).astype(matmul_dtype)
        # Fused QKV projection: one lane-dense (T, 3C) MXU pass, f32 accumulate.
        qkv = jnp.dot(h, wqkv_ref[...],
                      preferred_element_type=jnp.float32) + bqkv_ref[0]
        bias = bias_ref[...]                # (T, T) additive mask (0 / -1e30)
        scale = 1.0 / math.sqrt(D)

        acc = jnp.zeros((T, C), jnp.float32)
        for hh in range(n_head):            # static per-head loop
            lo = hh * D
            qh = (qkv[:, lo:lo + D] * scale).astype(matmul_dtype)
            kh = qkv[:, C + lo:C + lo + D].astype(matmul_dtype)
            vh = qkv[:, 2 * C + lo:2 * C + lo + D].astype(matmul_dtype)
            # q @ k^T with the transpose folded into the contraction dims.
            att = lax.dot_general(qh, kh,
                                  dimension_numbers=(((1,), (1,)), ((), ())),
                                  preferred_element_type=jnp.float32)
            att = att + bias
            att = att - jnp.max(att, axis=-1, keepdims=True)
            p = jnp.exp(att)
            denom = jnp.sum(p, axis=-1, keepdims=True)
            if approx_recip:
                inv = pl.reciprocal(denom, approx=True)   # EUP slot
            else:
                inv = 1.0 / denom
            # attn_drop: identity (inference)
            yh = jnp.dot(p.astype(matmul_dtype), vh,
                         preferred_element_type=jnp.float32) * inv
            # Fused output projection per head -> lane-dense (T, C) accumulator.
            acc = acc + jnp.dot(yh.astype(matmul_dtype), wp_ref[lo:lo + D, :],
                                preferred_element_type=jnp.float32)

        # resid_drop: identity (inference); proj bias added once.
        x1 = x + acc + bp_ref[0]

        # ---------------- MLP branch (chunked over hidden = 4C) ------------
        h2 = layernorm(x1, ln2g_ref[0], ln2b_ref[0]).astype(matmul_dtype)
        hidden = w1_ref.shape[1]
        chunk = hidden // n_hidden_chunks
        b1 = b1_ref[...]                    # (1, hidden), f32
        m_acc = jnp.zeros((T, C), jnp.float32)
        for c in range(n_hidden_chunks):
            lo = c * chunk
            mk = jnp.dot(h2, w1_ref[:, lo:lo + chunk],
                         preferred_element_type=jnp.float32) + b1[:, lo:lo + chunk]
            mk = 0.5 * mk * (1.0 + lax.erf(mk * inv_sqrt2))  # exact GELU (== nn.GELU)
            m_acc = m_acc + jnp.dot(mk.astype(matmul_dtype),
                                    w2_ref[lo:lo + chunk, :],
                                    preferred_element_type=jnp.float32)
        # mlp dropout: identity (inference); fc2 bias added once.
        o_ref[0] = (x1 + m_acc + b2_ref[0]).astype(o_ref.dtype)

    return kernel


def transformer_block(x, params, n_head, *, matmul_dtype=jnp.float32):
    """x: (B, T, C) float32.  params: PyTorch-convention weights (out, in)."""
    B, T, C = x.shape
    assert T % 3 == 0 and C % n_head == 0
    t = T // 3
    hidden = 4 * C

    mm = lambda a: a.astype(matmul_dtype)               # matmul operands
    vec = lambda a: a.reshape(1, -1).astype(jnp.float32)  # 1-D params -> (1, N)

    # Fused QKV weight (C, 3C); PyTorch weights are (out, in) -> transpose.
    wqkv = jnp.concatenate([params["wq"].T, params["wk"].T, params["wv"].T],
                           axis=1)
    bqkv = jnp.concatenate([params["bq"], params["bk"], params["bv"]])

    # Additive attention-mask bias built once from 1-D iotas:
    # allowed iff (col % t) <= (row % t)  (== tril(t,t) tiled 3x3).
    rm = jnp.arange(T, dtype=jnp.int32) % t
    mask_bias = jnp.where(rm[None, :] <= rm[:, None], 0.0, -1e30
                          ).astype(jnp.float32)

    # MLP hidden-dim chunking (caps the (T, chunk) live intermediate).
    chunk = 512 if hidden % 512 == 0 else hidden
    n_hidden_chunks = hidden // chunk

    ins = [
        x,
        mask_bias,
        vec(params["ln1_g"]), vec(params["ln1_b"]),
        mm(wqkv), vec(bqkv),
        mm(params["wp"].T), vec(params["bp"]),
        vec(params["ln2_g"]), vec(params["ln2_b"]),
        mm(params["w1"].T), vec(params["b1"]),
        mm(params["w2"].T), vec(params["b2"]),
    ]

    def full_spec(shape):
        nd = len(shape)
        return pl.BlockSpec(shape, lambda b, _nd=nd: (0,) * _nd)

    in_specs = [pl.BlockSpec((1, T, C), lambda b: (b, 0, 0))] + [
        full_spec(a.shape) for a in ins[1:]
    ]

    # Explicit VMEM budget: double-buffered pipelined operands + live
    # intermediates, with headroom (the default scoped limit is 16/32 MiB).
    mm_bytes = jnp.dtype(matmul_dtype).itemsize
    w_bytes = (3 * C * C + C * C + C * hidden + hidden * C) * mm_bytes
    small_bytes = (3 * C + hidden + 7 * C) * 4
    io_bytes = 2 * T * C * 4 + T * T * 4
    act_bytes = (9 * T * C + 2 * T * T + 2 * T * chunk) * 4
    est = 2 * (w_bytes + small_bytes + io_bytes) + act_bytes
    vmem_limit = int(min(100 * 2 ** 20, max(32 * 2 ** 20, 1.5 * est)))

    kernel = _make_block_kernel(
        n_head, n_hidden_chunks, matmul_dtype,
        approx_recip=(jnp.dtype(matmul_dtype) != jnp.dtype(jnp.float32)))

    return pl.pallas_call(
        kernel,
        out_shape=jax.ShapeDtypeStruct((B, T, C), x.dtype),
        grid_spec=pltpu.PrefetchScalarGridSpec(
            num_scalar_prefetch=0,
            grid=(B,),
            in_specs=in_specs,
            out_specs=pl.BlockSpec((1, T, C), lambda b: (b, 0, 0)),
        ),
        compiler_params=pltpu.CompilerParams(
            dimension_semantics=("parallel",),
            vmem_limit_bytes=vmem_limit),
    )(*ins)


# -------------------- pure-JAX reference (for validation) --------------------
def reference_block(x, params, n_head):
    def ln(v, g, b):
        mu = v.mean(-1, keepdims=True)
        var = ((v - mu) ** 2).mean(-1, keepdims=True)
        return (v - mu) / jnp.sqrt(var + 1e-5) * g + b

    B, T, C = x.shape
    D = C // n_head
    t = T // 3

    h = ln(x, params["ln1_g"], params["ln1_b"])
    q = h @ params["wq"].T + params["bq"]
    k = h @ params["wk"].T + params["bk"]
    v = h @ params["wv"].T + params["bv"]
    q = q.reshape(B, T, n_head, D).transpose(0, 2, 1, 3)
    k = k.reshape(B, T, n_head, D).transpose(0, 2, 1, 3)
    v = v.reshape(B, T, n_head, D).transpose(0, 2, 1, 3)
    att = (q @ jnp.swapaxes(k, -1, -2)) * (1.0 / math.sqrt(D))
    mask = jnp.tile(jnp.tril(jnp.ones((t, t), jnp.float32)), (3, 3))
    att = jnp.where(mask == 0, -jnp.inf, att)
    att = jax.nn.softmax(att, axis=-1)
    y = att @ v
    y = y.transpose(0, 2, 1, 3).reshape(B, T, C)
    y = y @ params["wp"].T + params["bp"]
    x1 = x + y

    h2 = ln(x1, params["ln2_g"], params["ln2_b"])
    m = h2 @ params["w1"].T + params["b1"]
    m = 0.5 * m * (1.0 + jax.lax.erf(m / math.sqrt(2.0)))
    m = m @ params["w2"].T + params["b2"]
    return x1 + m


if __name__ == "__main__":
    # Small config consistent with the module: T must be divisible by 3.
    B, T, C, n_head = 2, 24, 32, 4
    key = jax.random.PRNGKey(0)
    ks = jax.random.split(key, 16)
    s = 0.02

    params = {
        "ln1_g": jnp.ones((C,), jnp.float32),
        "ln1_b": jnp.zeros((C,), jnp.float32),
        "wq": s * jax.random.normal(ks[0], (C, C), jnp.float32),
        "bq": s * jax.random.normal(ks[1], (C,), jnp.float32),
        "wk": s * jax.random.normal(ks[2], (C, C), jnp.float32),
        "bk": s * jax.random.normal(ks[3], (C,), jnp.float32),
        "wv": s * jax.random.normal(ks[4], (C, C), jnp.float32),
        "bv": s * jax.random.normal(ks[5], (C,), jnp.float32),
        "wp": s * jax.random.normal(ks[6], (C, C), jnp.float32),
        "bp": s * jax.random.normal(ks[7], (C,), jnp.float32),
        "ln2_g": jnp.ones((C,), jnp.float32),
        "ln2_b": jnp.zeros((C,), jnp.float32),
        "w1": s * jax.random.normal(ks[8], (4 * C, C), jnp.float32),
        "b1": s * jax.random.normal(ks[9], (4 * C,), jnp.float32),
        "w2": s * jax.random.normal(ks[10], (C, 4 * C), jnp.float32),
        "b2": s * jax.random.normal(ks[11], (C,), jnp.float32),
    }

    x = jax.random.normal(ks[12], (B, T, C), jnp.float32)
    ref = jax.block_until_ready(reference_block(x, params, n_head))

    # f32 matmul path: tight check against the reference.
    out_f32 = jax.block_until_ready(
        transformer_block(x, params, n_head, matmul_dtype=jnp.float32))
    assert out_f32.shape == (B, T, C)
    assert jnp.allclose(out_f32, ref, rtol=1e-4, atol=1e-4), (
        float(jnp.max(jnp.abs(out_f32 - ref))))

    # bf16 matmul path (MXU-native on v6e/v7x): looser tolerance as expected.
    out_bf16 = jax.block_until_ready(
        transformer_block(x, params, n_head, matmul_dtype=jnp.bfloat16))
    assert out_bf16.shape == (B, T, C)
    assert jnp.allclose(out_bf16, ref, rtol=1e-2, atol=1e-2), (
        float(jnp.max(jnp.abs(out_bf16 - ref))))

    print("KERNEL_OK")
</pallas_src>

<mosaic_0001>
module attributes {stable_mosaic.version = 11 : i64} {
  func.func @kernel(%arg0: i32, %arg1: memref<1x24x32xf32, #tpu.memory_space<vmem>>, %arg2: memref<24x24xf32, #tpu.memory_space<vmem>>, %arg3: memref<1x32xf32, #tpu.memory_space<vmem>>, %arg4: memref<1x32xf32, #tpu.memory_space<vmem>>, %arg5: memref<32x96xf32, #tpu.memory_space<vmem>>, %arg6: memref<1x96xf32, #tpu.memory_space<vmem>>, %arg7: memref<32x32xf32, #tpu.memory_space<vmem>>, %arg8: memref<1x32xf32, #tpu.memory_space<vmem>>, %arg9: memref<1x32xf32, #tpu.memory_space<vmem>>, %arg10: memref<1x32xf32, #tpu.memory_space<vmem>>, %arg11: memref<32x128xf32, #tpu.memory_space<vmem>>, %arg12: memref<1x128xf32, #tpu.memory_space<vmem>>, %arg13: memref<128x32xf32, #tpu.memory_space<vmem>>, %arg14: memref<1x32xf32, #tpu.memory_space<vmem>>, %arg15: memref<1x24x32xf32, #tpu.memory_space<vmem>>) attributes {dimension_semantics = [#tpu.dimension_semantics<parallel>], iteration_bounds = array<i64: 2>, scalar_prefetch = 0 : i64, scratch_operands = 0 : i64, tpu.core_type = #tpu.core_type<tc>, window_params = [{transform_indices = @transform_0, window_bounds = array<i64: 1, 24, 32>}, {pipeline_mode = #tpu.pipeline_mode<synchronous>, transform_indices = @transform_1, window_bounds = array<i64: 24, 24>}, {pipeline_mode = #tpu.pipeline_mode<synchronous>, transform_indices = @transform_2, window_bounds = array<i64: 1, 32>}, {pipeline_mode = #tpu.pipeline_mode<synchronous>, transform_indices = @transform_3, window_bounds = array<i64: 1, 32>}, {pipeline_mode = #tpu.pipeline_mode<synchronous>, transform_indices = @transform_4, window_bounds = array<i64: 32, 96>}, {pipeline_mode = #tpu.pipeline_mode<synchronous>, transform_indices = @transform_5, window_bounds = array<i64: 1, 96>}, {pipeline_mode = #tpu.pipeline_mode<synchronous>, transform_indices = @transform_6, window_bounds = array<i64: 32, 32>}, {pipeline_mode = #tpu.pipeline_mode<synchronous>, transform_indices = @transform_7, window_bounds = array<i64: 1, 32>}, {pipeline_mode = #tpu.pipeline_mode<synchronous>, transform_indices = @transform_8, window_bounds = array<i64: 1, 32>}, {pipeline_mode = #tpu.pipeline_mode<synchronous>, transform_indices = @transform_9, window_bounds = array<i64: 1, 32>}, {pipeline_mode = #tpu.pipeline_mode<synchronous>, transform_indices = @transform_10, window_bounds = array<i64: 32, 128>}, {pipeline_mode = #tpu.pipeline_mode<synchronous>, transform_indices = @transform_11, window_bounds = array<i64: 1, 128>}, {pipeline_mode = #tpu.pipeline_mode<synchronous>, transform_indices = @transform_12, window_bounds = array<i64: 128, 32>}, {pipeline_mode = #tpu.pipeline_mode<synchronous>, transform_indices = @transform_13, window_bounds = array<i64: 1, 32>}, {transform_indices = @transform_14, window_bounds = array<i64: 1, 24, 32>}]} {
    %c0 = arith.constant 0 : index
    %c0_0 = arith.constant 0 : index
    %c0_1 = arith.constant 0 : index
    %0 = vector.load %arg1[%c0, %c0_0, %c0_1] : memref<1x24x32xf32, #tpu.memory_space<vmem>>, vector<1x24x32xf32>
    %1 = vector.shape_cast %0 : vector<1x24x32xf32> to vector<24x32xf32>
    %c0_2 = arith.constant 0 : index
    %c0_3 = arith.constant 0 : index
    %2 = vector.load %arg3[%c0_2, %c0_3] : memref<1x32xf32, #tpu.memory_space<vmem>>, vector<1x32xf32>
    %3 = vector.shape_cast %2 : vector<1x32xf32> to vector<32xf32>
    %c0_4 = arith.constant 0 : index
    %c0_5 = arith.constant 0 : index
    %4 = vector.load %arg4[%c0_4, %c0_5] : memref<1x32xf32, #tpu.memory_space<vmem>>, vector<1x32xf32>
    %5 = vector.shape_cast %4 : vector<1x32xf32> to vector<32xf32>
    %cst = arith.constant dense<0.000000e+00> : vector<24xf32>
    %6 = vector.multi_reduction <add>, %1, %cst [1] : vector<24x32xf32> to vector<24xf32>
    %7 = vector.shape_cast %6 : vector<24xf32> to vector<24x1xf32>
    %cst_6 = arith.constant 3.200000e+01 : f32
    %8 = vector.broadcast %cst_6 : f32 to vector<24x1xf32>
    %9 = arith.divf %7, %8 : vector<24x1xf32>
    %10 = vector.broadcast %9 : vector<24x1xf32> to vector<24x32xf32>
    %11 = arith.subf %1, %10 : vector<24x32xf32>
    %12 = arith.mulf %11, %11 : vector<24x32xf32>
    %cst_7 = arith.constant dense<0.000000e+00> : vector<24xf32>
    %13 = vector.multi_reduction <add>, %12, %cst_7 [1] : vector<24x32xf32> to vector<24xf32>
    %14 = vector.shape_cast %13 : vector<24xf32> to vector<24x1xf32>
    %cst_8 = arith.constant 3.200000e+01 : f32
    %15 = vector.broadcast %cst_8 : f32 to vector<24x1xf32>
    %16 = arith.divf %14, %15 : vector<24x1xf32>
    %17 = vector.broadcast %9 : vector<24x1xf32> to vector<24x32xf32>
    %18 = arith.subf %1, %17 : vector<24x32xf32>
    %cst_9 = arith.constant 9.99999974E-6 : f32
    %19 = vector.broadcast %cst_9 : f32 to vector<24x1xf32>
    %20 = arith.addf %16, %19 : vector<24x1xf32>
    %21 = math.rsqrt %20 : vector<24x1xf32>
    %22 = vector.broadcast %21 : vector<24x1xf32> to vector<24x32xf32>
    %23 = arith.mulf %18, %22 : vector<24x32xf32>
    %24 = vector.shape_cast %3 : vector<32xf32> to vector<1x32xf32>
    %25 = vector.broadcast %24 : vector<1x32xf32> to vector<24x32xf32>
    %26 = arith.mulf %23, %25 : vector<24x32xf32>
    %27 = vector.shape_cast %5 : vector<32xf32> to vector<1x32xf32>
    %28 = vector.broadcast %27 : vector<1x32xf32> to vector<24x32xf32>
    %29 = arith.addf %26, %28 : vector<24x32xf32>
    %c0_10 = arith.constant 0 : index
    %c0_11 = arith.constant 0 : index
    %30 = vector.load %arg5[%c0_10, %c0_11] : memref<32x96xf32, #tpu.memory_space<vmem>>, vector<32x96xf32>
    %cst_12 = arith.constant dense<0.000000e+00> : vector<24x96xf32>
    %31 = tpu.matmul %29, %30, %cst_12 {dimension_numbers = #tpu.dot_dimension_numbers<[1], [0], [0], [1], [0, 0, 1, 1], [], []>} : vector<24x32xf32>, vector<32x96xf32>, vector<24x96xf32> -> vector<24x96xf32>
    %c0_13 = arith.constant 0 : index
    %c0_14 = arith.constant 0 : index
    %32 = vector.load %arg6[%c0_13, %c0_14] : memref<1x96xf32, #tpu.memory_space<vmem>>, vector<1x96xf32>
    %33 = vector.shape_cast %32 : vector<1x96xf32> to vector<96xf32>
    %34 = vector.shape_cast %33 : vector<96xf32> to vector<1x96xf32>
    %35 = vector.broadcast %34 : vector<1x96xf32> to vector<24x96xf32>
    %36 = arith.addf %31, %35 : vector<24x96xf32>
    %c0_15 = arith.constant 0 : index
    %c0_16 = arith.constant 0 : index
    %37 = vector.load %arg2[%c0_15, %c0_16] : memref<24x24xf32, #tpu.memory_space<vmem>>, vector<24x24xf32>
    %cst_17 = arith.constant 0.000000e+00 : f32
    %38 = vector.broadcast %cst_17 : f32 to vector<24x32xf32>
    %39 = vector.extract_strided_slice %36 {offsets = [0, 0], sizes = [24, 8], strides = [1, 1]} : vector<24x96xf32> to vector<24x8xf32>
    %cst_18 = arith.constant 0.353553385 : f32
    %40 = vector.broadcast %cst_18 : f32 to vector<24x8xf32>
    %41 = arith.mulf %39, %40 : vector<24x8xf32>
    %42 = vector.extract_strided_slice %36 {offsets = [0, 32], sizes = [24, 8], strides = [1, 1]} : vector<24x96xf32> to vector<24x8xf32>
    %43 = vector.extract_strided_slice %36 {offsets = [0, 64], sizes = [24, 8], strides = [1, 1]} : vector<24x96xf32> to vector<24x8xf32>
    %cst_19 = arith.constant dense<0.000000e+00> : vector<24x24xf32>
    %44 = tpu.matmul %41, %42, %cst_19 {dimension_numbers = #tpu.dot_dimension_numbers<[1], [1], [0], [0], [0, 0, 1, 0], [], []>} : vector<24x8xf32>, vector<24x8xf32>, vector<24x24xf32> -> vector<24x24xf32>
    %45 = arith.addf %44, %37 : vector<24x24xf32>
    %cst_20 = arith.constant dense<0xFF800000> : vector<24xf32>
    %46 = vector.multi_reduction <maximumf>, %45, %cst_20 [1] : vector<24x24xf32> to vector<24xf32>
    %47 = vector.shape_cast %46 : vector<24xf32> to vector<24x1xf32>
    %48 = vector.broadcast %47 : vector<24x1xf32> to vector<24x24xf32>
    %49 = arith.subf %45, %48 : vector<24x24xf32>
    %50 = math.exp %49 : vector<24x24xf32>
    %cst_21 = arith.constant dense<0.000000e+00> : vector<24xf32>
    %51 = vector.multi_reduction <add>, %50, %cst_21 [1] : vector<24x24xf32> to vector<24xf32>
    %52 = vector.shape_cast %51 : vector<24xf32> to vector<24x1xf32>
    %cst_22 = arith.constant 1.000000e+00 : f32
    %53 = vector.broadcast %cst_22 : f32 to vector<24x1xf32>
    %54 = arith.divf %53, %52 : vector<24x1xf32>
    %cst_23 = arith.constant dense<0.000000e+00> : vector<24x8xf32>
    %55 = tpu.matmul %50, %43, %cst_23 {dimension_numbers = #tpu.dot_dimension_numbers<[1], [0], [0], [1], [0, 0, 1, 1], [], []>} : vector<24x24xf32>, vector<24x8xf32>, vector<24x8xf32> -> vector<24x8xf32>
    %56 = vector.broadcast %54 : vector<24x1xf32> to vector<24x8xf32>
    %57 = arith.mulf %55, %56 : vector<24x8xf32>
    %c0_24 = arith.constant 0 : index
    %c0_25 = arith.constant 0 : index
    %58 = vector.load %arg7[%c0_24, %c0_25] : memref<32x32xf32, #tpu.memory_space<vmem>>, vector<8x32xf32>
    %cst_26 = arith.constant dense<0.000000e+00> : vector<24x32xf32>
    %59 = tpu.matmul %57, %58, %cst_26 {dimension_numbers = #tpu.dot_dimension_numbers<[1], [0], [0], [1], [0, 0, 1, 1], [], []>} : vector<24x8xf32>, vector<8x32xf32>, vector<24x32xf32> -> vector<24x32xf32>
    %60 = arith.addf %38, %59 : vector<24x32xf32>
    %61 = vector.extract_strided_slice %36 {offsets = [0, 8], sizes = [24, 8], strides = [1, 1]} : vector<24x96xf32> to vector<24x8xf32>
    %cst_27 = arith.constant 0.353553385 : f32
    %62 = vector.broadcast %cst_27 : f32 to vector<24x8xf32>
    %63 = arith.mulf %61, %62 : vector<24x8xf32>
    %64 = vector.extract_strided_slice %36 {offsets = [0, 40], sizes = [24, 8], strides = [1, 1]} : vector<24x96xf32> to vector<24x8xf32>
    %65 = vector.extract_strided_slice %36 {offsets = [0, 72], sizes = [24, 8], strides = [1, 1]} : vector<24x96xf32> to vector<24x8xf32>
    %cst_28 = arith.constant dense<0.000000e+00> : vector<24x24xf32>
    %66 = tpu.matmul %63, %64, %cst_28 {dimension_numbers = #tpu.dot_dimension_numbers<[1], [1], [0], [0], [0, 0, 1, 0], [], []>} : vector<24x8xf32>, vector<24x8xf32>, vector<24x24xf32> -> vector<24x24xf32>
    %67 = arith.addf %66, %37 : vector<24x24xf32>
    %cst_29 = arith.constant dense<0xFF800000> : vector<24xf32>
    %68 = vector.multi_reduction <maximumf>, %67, %cst_29 [1] : vector<24x24xf32> to vector<24xf32>
    %69 = vector.shape_cast %68 : vector<24xf32> to vector<24x1xf32>
    %70 = vector.broadcast %69 : vector<24x1xf32> to vector<24x24xf32>
    %71 = arith.subf %67, %70 : vector<24x24xf32>
    %72 = math.exp %71 : vector<24x24xf32>
    %cst_30 = arith.constant dense<0.000000e+00> : vector<24xf32>
    %73 = vector.multi_reduction <add>, %72, %cst_30 [1] : vector<24x24xf32> to vector<24xf32>
    %74 = vector.shape_cast %73 : vector<24xf32> to vector<24x1xf32>
    %cst_31 = arith.constant 1.000000e+00 : f32
    %75 = vector.broadcast %cst_31 : f32 to vector<24x1xf32>
    %76 = arith.divf %75, %74 : vector<24x1xf32>
    %cst_32 = arith.constant dense<0.000000e+00> : vector<24x8xf32>
    %77 = tpu.matmul %72, %65, %cst_32 {dimension_numbers = #tpu.dot_dimension_numbers<[1], [0], [0], [1], [0, 0, 1, 1], [], []>} : vector<24x24xf32>, vector<24x8xf32>, vector<24x8xf32> -> vector<24x8xf32>
    %78 = vector.broadcast %76 : vector<24x1xf32> to vector<24x8xf32>
    %79 = arith.mulf %77, %78 : vector<24x8xf32>
    %c8 = arith.constant 8 : index
    %c0_33 = arith.constant 0 : index
    %80 = vector.load %arg7[%c8, %c0_33] : memref<32x32xf32, #tpu.memory_space<vmem>>, vector<8x32xf32>
    %cst_34 = arith.constant dense<0.000000e+00> : vector<24x32xf32>
    %81 = tpu.matmul %79, %80, %cst_34 {dimension_numbers = #tpu.dot_dimension_numbers<[1], [0], [0], [1], [0, 0, 1, 1], [], []>} : vector<24x8xf32>, vector<8x32xf32>, vector<24x32xf32> -> vector<24x32xf32>
    %82 = arith.addf %60, %81 : vector<24x32xf32>
    %83 = vector.extract_strided_slice %36 {offsets = [0, 16], sizes = [24, 8], strides = [1, 1]} : vector<24x96xf32> to vector<24x8xf32>
    %cst_35 = arith.constant 0.353553385 : f32
    %84 = vector.broadcast %cst_35 : f32 to vector<24x8xf32>
    %85 = arith.mulf %83, %84 : vector<24x8xf32>
    %86 = vector.extract_strided_slice %36 {offsets = [0, 48], sizes = [24, 8], strides = [1, 1]} : vector<24x96xf32> to vector<24x8xf32>
    %87 = vector.extract_strided_slice %36 {offsets = [0, 80], sizes = [24, 8], strides = [1, 1]} : vector<24x96xf32> to vector<24x8xf32>
    %cst_36 = arith.constant dense<0.000000e+00> : vector<24x24xf32>
    %88 = tpu.matmul %85, %86, %cst_36 {dimension_numbers = #tpu.dot_dimension_numbers<[1], [1], [0], [0], [0, 0, 1, 0], [], []>} : vector<24x8xf32>, vector<24x8xf32>, vector<24x24xf32> -> vector<24x24xf32>
    %89 = arith.addf %88, %37 : vector<24x24xf32>
    %cst_37 = arith.constant dense<0xFF800000> : vector<24xf32>
    %90 = vector.multi_reduction <maximumf>, %89, %cst_37 [1] : vector<24x24xf32> to vector<24xf32>
    %91 = vector.shape_cast %90 : vector<24xf32> to vector<24x1xf32>
    %92 = vector.broadcast %91 : vector<24x1xf32> to vector<24x24xf32>
    %93 = arith.subf %89, %92 : vector<24x24xf32>
    %94 = math.exp %93 : vector<24x24xf32>
    %cst_38 = arith.constant dense<0.000000e+00> : vector<24xf32>
    %95 = vector.multi_reduction <add>, %94, %cst_38 [1] : vector<24x24xf32> to vector<24xf32>
    %96 = vector.shape_cast %95 : vector<24xf32> to vector<24x1xf32>
    %cst_39 = arith.constant 1.000000e+00 : f32
    %97 = vector.broadcast %cst_39 : f32 to vector<24x1xf32>
    %98 = arith.divf %97, %96 : vector<24x1xf32>
    %cst_40 = arith.constant dense<0.000000e+00> : vector<24x8xf32>
    %99 = tpu.matmul %94, %87, %cst_40 {dimension_numbers = #tpu.dot_dimension_numbers<[1], [0], [0], [1], [0, 0, 1, 1], [], []>} : vector<24x24xf32>, vector<24x8xf32>, vector<24x8xf32> -> vector<24x8xf32>
    %100 = vector.broadcast %98 : vector<24x1xf32> to vector<24x8xf32>
    %101 = arith.mulf %99, %100 : vector<24x8xf32>
    %c16 = arith.constant 16 : index
    %c0_41 = arith.constant 0 : index
    %102 = vector.load %arg7[%c16, %c0_41] : memref<32x32xf32, #tpu.memory_space<vmem>>, vector<8x32xf32>
    %cst_42 = arith.constant dense<0.000000e+00> : vector<24x32xf32>
    %103 = tpu.matmul %101, %102, %cst_42 {dimension_numbers = #tpu.dot_dimension_numbers<[1], [0], [0], [1], [0, 0, 1, 1], [], []>} : vector<24x8xf32>, vector<8x32xf32>, vector<24x32xf32> -> vector<24x32xf32>
    %104 = arith.addf %82, %103 : vector<24x32xf32>
    %105 = vector.extract_strided_slice %36 {offsets = [0, 24], sizes = [24, 8], strides = [1, 1]} : vector<24x96xf32> to vector<24x8xf32>
    %cst_43 = arith.constant 0.353553385 : f32
    %106 = vector.broadcast %cst_43 : f32 to vector<24x8xf32>
    %107 = arith.mulf %105, %106 : vector<24x8xf32>
    %108 = vector.extract_strided_slice %36 {offsets = [0, 56], sizes = [24, 8], strides = [1, 1]} : vector<24x96xf32> to vector<24x8xf32>
    %109 = vector.extract_strided_slice %36 {offsets = [0, 88], sizes = [24, 8], strides = [1, 1]} : vector<24x96xf32> to vector<24x8xf32>
    %cst_44 = arith.constant dense<0.000000e+00> : vector<24x24xf32>
    %110 = tpu.matmul %107, %108, %cst_44 {dimension_numbers = #tpu.dot_dimension_numbers<[1], [1], [0], [0], [0, 0, 1, 0], [], []>} : vector<24x8xf32>, vector<24x8xf32>, vector<24x24xf32> -> vector<24x24xf32>
    %111 = arith.addf %110, %37 : vector<24x24xf32>
    %cst_45 = arith.constant dense<0xFF800000> : vector<24xf32>
    %112 = vector.multi_reduction <maximumf>, %111, %cst_45 [1] : vector<24x24xf32> to vector<24xf32>
    %113 = vector.shape_cast %112 : vector<24xf32> to vector<24x1xf32>
    %114 = vector.broadcast %113 : vector<24x1xf32> to vector<24x24xf32>
    %115 = arith.subf %111, %114 : vector<24x24xf32>
    %116 = math.exp %115 : vector<24x24xf32>
    %cst_46 = arith.constant dense<0.000000e+00> : vector<24xf32>
    %117 = vector.multi_reduction <add>, %116, %cst_46 [1] : vector<24x24xf32> to vector<24xf32>
    %118 = vector.shape_cast %117 : vector<24xf32> to vector<24x1xf32>
    %cst_47 = arith.constant 1.000000e+00 : f32
    %119 = vector.broadcast %cst_47 : f32 to vector<24x1xf32>
    %120 = arith.divf %119, %118 : vector<24x1xf32>
    %cst_48 = arith.constant dense<0.000000e+00> : vector<24x8xf32>
    %121 = tpu.matmul %116, %109, %cst_48 {dimension_numbers = #tpu.dot_dimension_numbers<[1], [0], [0], [1], [0, 0, 1, 1], [], []>} : vector<24x24xf32>, vector<24x8xf32>, vector<24x8xf32> -> vector<24x8xf32>
    %122 = vector.broadcast %120 : vector<24x1xf32> to vector<24x8xf32>
    %123 = arith.mulf %121, %122 : vector<24x8xf32>
    %c24 = arith.constant 24 : index
    %c0_49 = arith.constant 0 : index
    %124 = vector.load %arg7[%c24, %c0_49] : memref<32x32xf32, #tpu.memory_space<vmem>>, vector<8x32xf32>
    %cst_50 = arith.constant dense<0.000000e+00> : vector<24x32xf32>
    %125 = tpu.matmul %123, %124, %cst_50 {dimension_numbers = #tpu.dot_dimension_numbers<[1], [0], [0], [1], [0, 0, 1, 1], [], []>} : vector<24x8xf32>, vector<8x32xf32>, vector<24x32xf32> -> vector<24x32xf32>
    %126 = arith.addf %104, %125 : vector<24x32xf32>
    %127 = arith.addf %1, %126 : vector<24x32xf32>
    %c0_51 = arith.constant 0 : index
    %c0_52 = arith.constant 0 : index
    %128 = vector.load %arg8[%c0_51, %c0_52] : memref<1x32xf32, #tpu.memory_space<vmem>>, vector<1x32xf32>
    %129 = vector.shape_cast %128 : vector<1x32xf32> to vector<32xf32>
    %130 = vector.shape_cast %129 : vector<32xf32> to vector<1x32xf32>
    %131 = vector.broadcast %130 : vector<1x32xf32> to vector<24x32xf32>
    %132 = arith.addf %127, %131 : vector<24x32xf32>
    %c0_53 = arith.constant 0 : index
    %c0_54 = arith.constant 0 : index
    %133 = vector.load %arg9[%c0_53, %c0_54] : memref<1x32xf32, #tpu.memory_space<vmem>>, vector<1x32xf32>
    %134 = vector.shape_cast %133 : vector<1x32xf32> to vector<32xf32>
    %c0_55 = arith.constant 0 : index
    %c0_56 = arith.constant 0 : index
    %135 = vector.load %arg10[%c0_55, %c0_56] : memref<1x32xf32, #tpu.memory_space<vmem>>, vector<1x32xf32>
    %136 = vector.shape_cast %135 : vector<1x32xf32> to vector<32xf32>
    %cst_57 = arith.constant dense<0.000000e+00> : vector<24xf32>
    %137 = vector.multi_reduction <add>, %132, %cst_57 [1] : vector<24x32xf32> to vector<24xf32>
    %138 = vector.shape_cast %137 : vector<24xf32> to vector<24x1xf32>
    %cst_58 = arith.constant 3.200000e+01 : f32
    %139 = vector.broadcast %cst_58 : f32 to vector<24x1xf32>
    %140 = arith.divf %138, %139 : vector<24x1xf32>
    %141 = vector.broadcast %140 : vector<24x1xf32> to vector<24x32xf32>
    %142 = arith.subf %132, %141 : vector<24x32xf32>
    %143 = arith.mulf %142, %142 : vector<24x32xf32>
    %cst_59 = arith.constant dense<0.000000e+00> : vector<24xf32>
    %144 = vector.multi_reduction <add>, %143, %cst_59 [1] : vector<24x32xf32> to vector<24xf32>
    %145 = vector.shape_cast %144 : vector<24xf32> to vector<24x1xf32>
    %cst_60 = arith.constant 3.200000e+01 : f32
    %146 = vector.broadcast %cst_60 : f32 to vector<24x1xf32>
    %147 = arith.divf %145, %146 : vector<24x1xf32>
    %148 = vector.broadcast %140 : vector<24x1xf32> to vector<24x32xf32>
    %149 = arith.subf %132, %148 : vector<24x32xf32>
    %cst_61 = arith.constant 9.99999974E-6 : f32
    %150 = vector.broadcast %cst_61 : f32 to vector<24x1xf32>
    %151 = arith.addf %147, %150 : vector<24x1xf32>
    %152 = math.rsqrt %151 : vector<24x1xf32>
    %153 = vector.broadcast %152 : vector<24x1xf32> to vector<24x32xf32>
    %154 = arith.mulf %149, %153 : vector<24x32xf32>
    %155 = vector.shape_cast %134 : vector<32xf32> to vector<1x32xf32>
    %156 = vector.broadcast %155 : vector<1x32xf32> to vector<24x32xf32>
    %157 = arith.mulf %154, %156 : vector<24x32xf32>
    %158 = vector.shape_cast %136 : vector<32xf32> to vector<1x32xf32>
    %159 = vector.broadcast %158 : vector<1x32xf32> to vector<24x32xf32>
    %160 = arith.addf %157, %159 : vector<24x32xf32>
    %c0_62 = arith.constant 0 : index
    %c0_63 = arith.constant 0 : index
    %161 = vector.load %arg12[%c0_62, %c0_63] : memref<1x128xf32, #tpu.memory_space<vmem>>, vector<1x128xf32>
    %cst_64 = arith.constant 0.000000e+00 : f32
    %162 = vector.broadcast %cst_64 : f32 to vector<24x32xf32>
    %c0_65 = arith.constant 0 : index
    %c0_66 = arith.constant 0 : index
    %163 = vector.load %arg11[%c0_65, %c0_66] : memref<32x128xf32, #tpu.memory_space<vmem>>, vector<32x128xf32>
    %cst_67 = arith.constant dense<0.000000e+00> : vector<24x128xf32>
    %164 = tpu.matmul %160, %163, %cst_67 {dimension_numbers = #tpu.dot_dimension_numbers<[1], [0], [0], [1], [0, 0, 1, 1], [], []>} : vector<24x32xf32>, vector<32x128xf32>, vector<24x128xf32> -> vector<24x128xf32>
    %165 = vector.broadcast %161 : vector<1x128xf32> to vector<24x128xf32>
    %166 = arith.addf %164, %165 : vector<24x128xf32>
    %cst_68 = arith.constant 5.000000e-01 : f32
    %167 = vector.broadcast %cst_68 : f32 to vector<24x128xf32>
    %168 = arith.mulf %167, %166 : vector<24x128xf32>
    %cst_69 = arith.constant 0.707106769 : f32
    %169 = vector.broadcast %cst_69 : f32 to vector<24x128xf32>
    %170 = arith.mulf %166, %169 : vector<24x128xf32>
    %171 = math.erf %170 : vector<24x128xf32>
    %cst_70 = arith.constant 1.000000e+00 : f32
    %172 = vector.broadcast %cst_70 : f32 to vector<24x128xf32>
    %173 = arith.addf %172, %171 : vector<24x128xf32>
    %174 = arith.mulf %168, %173 : vector<24x128xf32>
    %c0_71 = arith.constant 0 : index
    %c0_72 = arith.constant 0 : index
    %175 = vector.load %arg13[%c0_71, %c0_72] : memref<128x32xf32, #tpu.memory_space<vmem>>, vector<128x32xf32>
    %cst_73 = arith.constant dense<0.000000e+00> : vector<24x32xf32>
    %176 = tpu.matmul %174, %175, %cst_73 {dimension_numbers = #tpu.dot_dimension_numbers<[1], [0], [0], [1], [0, 0, 1, 1], [], []>} : vector<24x128xf32>, vector<128x32xf32>, vector<24x32xf32> -> vector<24x32xf32>
    %177 = arith.addf %162, %176 : vector<24x32xf32>
    %178 = arith.addf %132, %177 : vector<24x32xf32>
    %c0_74 = arith.constant 0 : index
    %c0_75 = arith.constant 0 : index
    %179 = vector.load %arg14[%c0_74, %c0_75] : memref<1x32xf32, #tpu.memory_space<vmem>>, vector<1x32xf32>
    %180 = vector.shape_cast %179 : vector<1x32xf32> to vector<32xf32>
    %181 = vector.shape_cast %180 : vector<32xf32> to vector<1x32xf32>
    %182 = vector.broadcast %181 : vector<1x32xf32> to vector<24x32xf32>
    %183 = arith.addf %178, %182 : vector<24x32xf32>
    %c0_76 = arith.constant 0 : index
    %c0_77 = arith.constant 0 : index
    %c0_78 = arith.constant 0 : index
    %184 = vector.load %arg15[%c0_76, %c0_77, %c0_78] : memref<1x24x32xf32, #tpu.memory_space<vmem>>, vector<1x24x32xf32>
    %185 = vector.shape_cast %184 : vector<1x24x32xf32> to vector<24x32xf32>
    %186 = vector.shape_cast %183 : vector<24x32xf32> to vector<1x24x32xf32>
    tpu.vector_store %arg15[%c0_76, %c0_77, %c0_78], %186 {strides = array<i32>} : memref<1x24x32xf32, #tpu.memory_space<vmem>>, vector<1x24x32xf32>,
    return
  }
  func.func @transform_0(%arg0: i32) -> (i32, i32, i32) {
    %c0_i32 = arith.constant 0 : i32
    %c0_i32_0 = arith.constant 0 : i32
    %c0_i32_1 = arith.constant 0 : i32
    return %arg0, %c0_i32, %c0_i32_0 : i32, i32, i32
  }
  func.func @transform_1(%arg0: i32) -> (i32, i32) {
    %c0_i32 = arith.constant 0 : i32
    %c0_i32_0 = arith.constant 0 : i32
    %c0_i32_1 = arith.constant 0 : i32
    return %c0_i32, %c0_i32_0 : i32, i32
  }
  func.func @transform_2(%arg0: i32) -> (i32, i32) {
    %c0_i32 = arith.constant 0 : i32
    %c0_i32_0 = arith.constant 0 : i32
    %c0_i32_1 = arith.constant 0 : i32
    return %c0_i32, %c0_i32_0 : i32, i32
  }
  func.func @transform_3(%arg0: i32) -> (i32, i32) {
    %c0_i32 = arith.constant 0 : i32
    %c0_i32_0 = arith.constant 0 : i32
    %c0_i32_1 = arith.constant 0 : i32
    return %c0_i32, %c0_i32_0 : i32, i32
  }
  func.func @transform_4(%arg0: i32) -> (i32, i32) {
    %c0_i32 = arith.constant 0 : i32
    %c0_i32_0 = arith.constant 0 : i32
    %c0_i32_1 = arith.constant 0 : i32
    return %c0_i32, %c0_i32_0 : i32, i32
  }
  func.func @transform_5(%arg0: i32) -> (i32, i32) {
    %c0_i32 = arith.constant 0 : i32
    %c0_i32_0 = arith.constant 0 : i32
    %c0_i32_1 = arith.constant 0 : i32
    return %c0_i32, %c0_i32_0 : i32, i32
  }
  func.func @transform_6(%arg0: i32) -> (i32, i32) {
    %c0_i32 = arith.constant 0 : i32
    %c0_i32_0 = arith.constant 0 : i32
    %c0_i32_1 = arith.constant 0 : i32
    return %c0_i32, %c0_i32_0 : i32, i32
  }
  func.func @transform_7(%arg0: i32) -> (i32, i32) {
    %c0_i32 = arith.constant 0 : i32
    %c0_i32_0 = arith.constant 0 : i32
    %c0_i32_1 = arith.constant 0 : i32
    return %c0_i32, %c0_i32_0 : i32, i32
  }
  func.func @transform_8(%arg0: i32) -> (i32, i32) {
    %c0_i32 = arith.constant 0 : i32
    %c0_i32_0 = arith.constant 0 : i32
    %c0_i32_1 = arith.constant 0 : i32
    return %c0_i32, %c0_i32_0 : i32, i32
  }
  func.func @transform_9(%arg0: i32) -> (i32, i32) {
    %c0_i32 = arith.constant 0 : i32
    %c0_i32_0 = arith.constant 0 : i32
    %c0_i32_1 = arith.constant 0 : i32
    return %c0_i32, %c0_i32_0 : i32, i32
  }
  func.func @transform_10(%arg0: i32) -> (i32, i32) {
    %c0_i32 = arith.constant 0 : i32
    %c0_i32_0 = arith.constant 0 : i32
    %c0_i32_1 = arith.constant 0 : i32
    return %c0_i32, %c0_i32_0 : i32, i32
  }
  func.func @transform_11(%arg0: i32) -> (i32, i32) {
    %c0_i32 = arith.constant 0 : i32
    %c0_i32_0 = arith.constant 0 : i32
    %c0_i32_1 = arith.constant 0 : i32
    return %c0_i32, %c0_i32_0 : i32, i32
  }
  func.func @transform_12(%arg0: i32) -> (i32, i32) {
    %c0_i32 = arith.constant 0 : i32
    %c0_i32_0 = arith.constant 0 : i32
    %c0_i32_1 = arith.constant 0 : i32
    return %c0_i32, %c0_i32_0 : i32, i32
  }
  func.func @transform_13(%arg0: i32) -> (i32, i32) {
    %c0_i32 = arith.constant 0 : i32
    %c0_i32_0 = arith.constant 0 : i32
    %c0_i32_1 = arith.constant 0 : i32
    return %c0_i32, %c0_i32_0 : i32, i32
  }
  func.func @transform_14(%arg0: i32) -> (i32, i32, i32) {
    %c0_i32 = arith.constant 0 : i32
    %c0_i32_0 = arith.constant 0 : i32
    %c0_i32_1 = arith.constant 0 : i32
    return %arg0, %c0_i32, %c0_i32_0 : i32, i32, i32
  }
}

</mosaic_0001>

<bundles_post_ra>
// kernel: tpu_custom_call.1
= control target key start
LH: loop header
LB: loop body
LE: loop exit
PB: predicated region body
PF: predicated region fallthrough
CT: control target
= control target key end

     0   :  { %s3664_s0 = inlined_call_operand.vmem [shape: f32[2,24,32], index: 0, kind: input, shape index: {}]   ;;  %s3665_s1 = inlined_call_operand.hbm [shape: f32[24,24], index: 1, kind: input, shape index: {}]   ;;  %s3666_s2 = inlined_call_operand.vmem [shape: f32[1,32], index: 2, kind: input, shape index: {}]   ;;  %s3667_s3 = inlined_call_operand.vmem [shape: f32[1,32], index: 3, kind: input, shape index: {}]   ;;  %s3668_s4 = inlined_call_operand.vmem [shape: f32[32,96], index: 4, kind: input, shape index: {}]   ;;  %s3669_s5 = inlined_call_operand.vmem [shape: f32[1,96], index: 5, kind: input, shape index: {}]   ;;  %s3670_s6 = inlined_call_operand.vmem [shape: f32[32,32], index: 6, kind: input, shape index: {}]   ;;  %s3671_s7 = inlined_call_operand.vmem [shape: f32[1,32], index: 7, kind: input, shape index: {}]   ;;  %s3672_s8 = inlined_call_operand.vmem [shape: f32[1,32], index: 8, kind: input, shape index: {}]   ;;  %s3673_s9 = inlined_call_operand.vmem [shape: f32[1,32], index: 9, kind: input, shape index: {}]   ;;  %s3674_s10 = inlined_call_operand.vmem [shape: f32[32,128], index: 10, kind: input, shape index: {}]   ;;  %s3675_s11 = inlined_call_operand.vmem [shape: f32[1,128], index: 11, kind: input, shape index: {}]   ;;  %s3676_s12 = inlined_call_operand.vmem [shape: f32[128,32], index: 12, kind: input, shape index: {}]   ;;  %s3677_s13 = inlined_call_operand.vmem [shape: f32[1,32], index: 13, kind: input, shape index: {}]   ;;  %s3678_s14 = inlined_call_operand.hbm [shape: f32[2,24,32], index: 14, kind: output, shape index: {}]  }
   0x1   :  { %3682 = sst [smem:[#allocation11_spill]] %s3664_s0 }
   0x2   :  { %19 = vsyncpa [#allocation3], 0 }
   0x3   :  { %20 = vsyncpa [#allocation4], 0 }
   0x4   :  { %22 = vsyncpa [#allocation4 + $0x1], 0  ;;  %s3091_s29 = smov 0   ;;  %s3093_s30 = smov 0  }
   0x5   :  { %s3095_s15 = smov 0   ;;  %s3097_s16 = smov 0  }
   0x6 LB: > { %3683 = sst [smem:[#allocation8_spill]] %s2991_s15  ;;  %s3112_s17 = sadd.s32 4294967295, %s2995_s16   ;;  %s2995_s16 = sphi %s3097_s16, %s3691_s16   ;;  %s2991_s15 = sphi %s3095_s15, %s3693_s15   ;;  %s2987_s30 = sphi %s3093_s30, %s3695_s30   ;;  %s2983_s29 = sphi %s3091_s29, %s3694_s29  }
   0x7   : > { %s2358_s18 = sadd.s32 4294967294, %s2995_s16   ;;  %s3116_s19 = sadd.s32 1, %s2995_s16  }
   0x8   : > { %3684 = sst [smem:[#allocation9_spill]] %s3116_s19  ;;  %s334_s20 = sadd.s32 1, %s2991_s15 }
   0x9   : > { %s331_s21 = ssub.s32 %s2995_s16, %s3116_s19  ;;  %p344_p0 = scmp.ne.s32.totalorder %s2991_s15, %s2987_s30 }
   0xa   : > { %p332_p1 = scmp.eq.s32.totalorder %s331_s21, 0  ;;  %p345_p2 = scmp.eq.s32.totalorder %s3112_s17, 1 }
   0xb   : > { %p350_p3 = scmp.ne.s32.totalorder %s2987_s30, %s2983_s29  ;;  %p351_p4 = scmp.eq.s32.totalorder %s2358_s18, 1 }
   0xc   : > { %s3127_s22 = scalar_select %p332_p1, %s2991_s15, %s334_s20  }
   0xd   : > { %p3129_p5 = por %p345_p2, %p344_p0  ;;  %p3133_p6 = por %p351_p4, %p350_p3 }
   0xe   : > { %3685 = sst [smem:[#allocation10_spill]] %s3127_s22  ;;  %p2359_p7 = scmp.ge.s32.totalorder %s2995_s16, 1 }
   0xf   : > { %s3687_s24 = scalar_select %p3133_p6, 1, 0 }
  0x10   : > { %p358_p8 = scmp.lt.s32.totalorder %s2995_s16, 3  ;;  %p2783_p9 = scmp.eq.s32.totalorder %s3112_s17, 0 }
  0x11   : > { %s2997_s26 = smov [#allocation2]  }
  0x12   : > { %p3140_p10 = pnand %p2359_p7, %p358_p8  ;;  %s370_s27 = sshll.u32 %s2997_s26, 4  ;;  %s371_s27 = int_to_ptr.vmem [resolvable:$true] %s370_s27 }
  0x13   : > { %s2916_s28 = scalar_lea.vmem %s371_s27, 384  ;;  %p2924_p3 = scmp.lt.s32.totalorder %s371_s27, %s371_s27 }
  0x14   : > { %p2775_p11 = pneg %p3140_p10  ;;  %p2917_p0 = scmp.ne.s32.totalorder %s371_s27, %s2916_s28 }
  0x15   : > { %p2925_p4 = scmp.lt.s32.totalorder %s2916_s28, %s2916_s28 }
  0x16   : > { %p2776_p12 = pnand %p2783_p9, %p2775_p11 }
  0x17   : > { %p2926_p6 = por %p2925_p4, %p2924_p3 }
  0x18   : > { %p2907_p13 = pneg %p2776_p12 }
  0x1a   : > { %p2919_p1 = pnand %p2917_p0, %p2907_p13 }
  0x1c   : > { %p2920_p2 = pneg %p2919_p1 }
  0x1e   : > { %p2927_p7 = pnand %p2926_p6, %p2920_p2 }
  0x20   : > { %2930 = shalt.err (!%p2927_p7)
}
  0x21   : > { %s2998_s18 = smov 128   ;;  %s2999_s20 = smov 8  }
  0x22   : > { %2778 = dma.hbm_to_vmem [thread:$0]  (!%p2776_p12), %s3665_s1, 384, %s371_s27, [#allocation3], %s2998_s18, %s2998_s18, %s2999_s20  }
  0x23   : > { %430 = sbr.rel (%p3140_p10) target bundleno = 3110 (0xc26), region = 76 }
  0x28   : > { %2974 = dma.done.wait (%p2783_p9), [#allocation3], 384  }
  0x29   : > { %2976 = vsyncadd (%p2783_p9), [#allocation3], 4294966912  ;;  %p476_p8 = scmp.lt.s32.totalorder %s3112_s17, 1  ;;  %vm486_vm0 = vcmask 261120   ;;  %s3689_s0 = sld [smem:[#allocation11_spill]]  ;;  %v548_v21 = vld [vmem:[%s3668_s4 + $0x18] sm:$0xff] }
  0x2a   : > { %v3000_v22 = vmov 0.0   ;;  %v547_v23 = vld [vmem:[%s3668_s4 + $0x10] sm:$0xff]  ;;  %vm3001_vm1 = vmmov 0   ;;  %v546_v24 = vld [vmem:[%s3668_s4 + $0x8] sm:$0xff]  ;;  %v545_v25 = vld [vmem:[%s3668_s4] sm:$0xff]  ;;  %s3002_s20 = smov 96  }
  0x2b   : > { %s477_s26 = scalar_select %p476_p8, %s3112_s17, 1  ;;  %2527 = vmatprep.subr.mxu1 %v3000_v22  ;;  %2535 = vmatprep.mubr.msk.f32.mxu1 %vm3001_vm1, %v3000_v22  ;;  %v2365_v36 = vld [vmem:[%s3666_s2] ss:$0 sm:$0xff]  ;;  %vm660_vm2 = vcmask 64512   ;;  %vm756_vm3 = vcmask 195584  }
  0x2c   : > { %2528 = vmatpush3.msra.mxu1 %v548_v21  ;;  %2559 = vmatprep.subr.mxu0 %v3000_v22  ;;  %v2366_v38 = vld [vmem:[%s3667_s3] ss:$0 sm:$0xff]  ;;  %s3003_s21 = smov 88   ;;  %s3006_s15 = smov 56  }
  0x2d   : > { %s2767_s28 = smul.u32 24, %s477_s26  ;;  %2529 = vmatprep.subr.mxu1 %v3000_v22  ;;  %2565 = vmatprep.mubr.msk.f32.mxu0 %vm3001_vm1, %v3000_v22  ;;  %v2367_v51 = vld [vmem:[%s3669_s5] ss:$0 sm:$0xff]  ;;  %s3004_s26 = smov 120  }
  0x2e   : > { %2530 = vmatpush3.msra.mxu1 %v547_v23  ;;  %s3007_s19 = smov 80   ;;  %s3008_s25 = smov 112  }
  0x2f   : > { %s3162_s22 = scalar_lea.vmem %s3689_s0, %s2767_s28  ;;  %2531 = vmatprep.subr.mxu1 %v3000_v22  ;;  %s3005_s28 = smov 64  }
  0x30   : > { %v481_v0 = vld [vmem:[%s3162_s22] sm:$0xff]  ;;  %v483_v1 = vld [vmem:[%s3162_s22 + $0x10] sm:$0xff]  ;;  %v482_v2 = vld [vmem:[%s3162_s22 + $0x8] sm:$0xff]  ;;  %2532 = vmatpush3.msra.mxu1 %v546_v24  ;;  %s473_s18 = sand.u32 1, %s2987_s30  }
  0x31   : > { %v487_v3 = vsel %vm486_vm0, %v481_v0, 0.0  ;;  %v493_v4 = vsel %vm486_vm0, %v483_v1, 0.0  ;;  %v490_v5 = vsel %vm486_vm0, %v482_v2, 0.0  ;;  %2533 = vmatprep.subr.mxu1 %v3000_v22 }
  0x32   : > { %488 = vadd.xlane.f32.xlu0 %v487_v3  ;;  %494 = vadd.xlane.f32.xlu1 %v493_v4 }
  0x33   : > { %2534 = vmatpush3.msra.mxu1 %v545_v25 }
  0x34   : > { %2544 = vmatprep.subr.mxu1 %v3000_v22 }
  0x36   : > { %491 = vadd.xlane.f32.xlu0 %v490_v5 }
  0xbb   : > { %v489_v6 = vpop.xlane.xlu0 %488  ;;  %v495_v7 = vpop.xlane.xlu1 %494 }
  0xbc   : > { %v497_v8 = vmul.f32 0.03125, %v489_v6  ;;  %v499_v9 = vmul.f32 0.03125, %v495_v7 }
  0xbe   : > { %v500_v10 = vsub.f32 %v481_v0, %v497_v8  ;;  %v502_v11 = vsub.f32 %v483_v1, %v499_v9 }
  0xbf   : > { %v492_v12 = vpop.xlane.xlu0 %491 }
  0xc0   : > { %v498_v13 = vmul.f32 0.03125, %v492_v12  ;;  %v503_v14 = vmul.f32 %v500_v10, %v500_v10  ;;  %v505_v15 = vmul.f32 %v502_v11, %v502_v11 }
  0xc2   : > { %v501_v16 = vsub.f32 %v482_v2, %v498_v13  ;;  %v506_v17 = vsel %vm486_vm0, %v503_v14, 0.0  ;;  %v512_v18 = vsel %vm486_vm0, %v505_v15, 0.0  ;;  %v3281_v14 = vld [vmem:[#allocation2 + $0x8] sm:$0xff] }
  0xc3   : > { %507 = vadd.xlane.f32.xlu1 %v506_v17 }
  0xc4   : > { %v504_v19 = vmul.f32 %v501_v16, %v501_v16 }
  0xc6   : > { %v509_v20 = vsel %vm486_vm0, %v504_v19, 0.0  ;;  %v3285_v19 = vld [vmem:[#allocation2 + $0x10] sm:$0xff] }
  0xc7   : > { %513 = vadd.xlane.f32.xlu1 %v512_v18  ;;  %510 = vadd.xlane.f32.xlu0 %v509_v20 }
 0x14c   : > { %v508_v26 = vpop.xlane.xlu1 %507 }
 0x14d   : > { %v515_v27 = vmul.f32 0.03125, %v508_v26 }
 0x14f   : > { %v518_v28 = vadd.f32 1e-05, %v515_v27 }
 0x150   : > { %v514_v29 = vpop.xlane.xlu1 %513  ;;  %v511_v30 = vpop.xlane.xlu0 %510 }
 0x151   : > { %2836 = vrsqrt.f32 %v518_v28  ;;  %v517_v31 = vmul.f32 0.03125, %v514_v29  ;;  %v516_v32 = vmul.f32 0.03125, %v511_v30 }
 0x153   : > { %v520_v33 = vadd.f32 1e-05, %v517_v31  ;;  %v519_v34 = vadd.f32 1e-05, %v516_v32 }
 0x155   : > { %2838 = vrsqrt.f32 %v520_v33 }
 0x156   : > { %2840 = vrsqrt.f32 %v519_v34 }
 0x15e   : > { %v2837_v35 = vpop.eup %2836 }
 0x15f   : > { %v524_v37 = vmul.f32 %v2837_v35, %v500_v10  ;;  %v3278_v10 = vld [vmem:[#allocation2] sm:$0xff] }
 0x161   : > { %v533_v39 = vmul.f32 %v2365_v36, %v524_v37 }
 0x162   : > { %v2839_v40 = vpop.eup %2838 }
 0x163   : > { %v2841_v41 = vpop.eup %2840  ;;  %v542_v42 = vadd.f32 %v2366_v38, %v533_v39  ;;  %v526_v44 = vmul.f32 %v2839_v40, %v502_v11 }
 0x164   : > { %v525_v43 = vmul.f32 %v2841_v41, %v501_v16 }
 0x165   : > { %2536 = vmatmul.mubr.msk.f32.vlgmr.msra.gmra.mxu1 %vm486_vm0, %v542_v42  ;;  %v535_v47 = vmul.f32 %v2365_v36, %v526_v44 }
 0x166   : > { %2538 = vmatprep.mubr.msk.f32.mxu1 %vm3001_vm1, %v3000_v22  ;;  %v534_v45 = vmul.f32 %v2365_v36, %v525_v43 }
 0x167   : > { %v544_v48 = vadd.f32 %v2366_v38, %v535_v47 }
 0x168   : > { %v543_v46 = vadd.f32 %v2366_v38, %v534_v45 }
 0x16a   : > { %2539 = vmatmul.mubr.msk.f32.gmra.mxu1 %vm486_vm0, %v543_v46 }
 0x16b   : > { %2541 = vmatprep.mubr.msk.f32.mxu1 %vm3001_vm1, %v3000_v22 }
 0x16e   : > { %2542 = vmatmul.mubr.msk.f32.gmra.mxu1 %vm486_vm0, %v544_v48 }
 0x16f   : > { %2550 = vmatprep.mubr.msk.f32.mxu1 %vm3001_vm1, %v3000_v22 }
 0x225   : > { %v631_v49 = vpop.f32.mrf.mxu1 }
 0x226   : > { %v3216_v56 = vadd.f32 %v2367_v51, %v631_v49 }
 0x227   : > { %v2537_v50 = vpop.f32.mrf.mxu1 }
 0x228   : > { %v3225_v59 = vmul.f32 0.35355338, %v3216_v56 }
 0x22a   : > { %v636_v52 = vpop.f32.mrf.mxu1 }
 0x22b   : > { %v3213_v53 = vadd.f32 %v2367_v51, %v636_v52 }
 0x22c   : > { %v2540_v54 = vpop.f32.mrf.mxu1 }
 0x22d   : > { %656 = vrot.lane.b32.xlu1 %v3213_v53, %s3002_s20  ;;  %v3230_v60 = vmul.f32 0.35355338, %v3213_v53 }
 0x22e   : > { %v641_v55 = vpop.f32.mrf.mxu1 }
 0x22f   : > { %v3218_v57 = vadd.f32 %v2367_v51, %v641_v55 }
 0x230   : > { %v2543_v58 = vpop.f32.mrf.mxu1 }
 0x231   : > { %654 = vrot.lane.b32.xlu1 %v3216_v56, %s3002_s20  ;;  %658 = vrot.lane.b32.xlu0 %v3218_v57, %s3002_s20  ;;  %v3233_v61 = vmul.f32 0.35355338, %v3218_v57  ;;  %s3009_s20 = smov 48  }
 0x235   : > { %902 = vrot.lane.b32.xlu1 %v3218_v57, %s3003_s21  ;;  %900 = vrot.lane.b32.xlu0 %v3213_v53, %s3003_s21 }
 0x239   : > { %898 = vrot.lane.b32.xlu1 %v3216_v56, %s3003_s21  ;;  %892 = vrot.lane.b32.xlu0 %v3225_v59, %s3004_s26  ;;  %s3013_s21 = smov [#allocation5]  }
 0x23d   : > { %894 = vrot.lane.b32.xlu1 %v3230_v60, %s3004_s26  ;;  %896 = vrot.lane.b32.xlu0 %v3233_v61, %s3004_s26  ;;  %s2935_s26 = sshll.u32 %s3013_s21, 4  ;;  %s2936_s26 = int_to_ptr.vmem [resolvable:$false] %s2935_s26 }
 0x23e   : > { %s2937_s0 = scalar_lea.vmem %s2936_s26, 768 }
 0x241   : > { %794 = vrot.lane.b32.xlu1 %v3218_v57, %s3005_s28  ;;  %792 = vrot.lane.b32.xlu0 %v3213_v53, %s3005_s28 }
 0x245   : > { %790 = vrot.lane.b32.xlu1 %v3216_v56, %s3005_s28  ;;  %s3010_s28 = smov 72  }
 0x249   : > { %1033 = vrot.lane.b32.xlu1 %v3218_v57, %s3006_s15 }
 0x29f   : > { %v657_v62 = vpop.permute.xlu1 %656 }
 0x2a3   : > { %v655_v63 = vpop.permute.xlu1 %654  ;;  %v659_v0 = vpop.permute.xlu0 %658 }
 0x2a4   : > { %2545 = vmatpush3.xpose.msk.msra.mxu1 %vm660_vm2, %v659_v0 }
 0x2a5   : > { %2546 = vmatprep.subr.mxu1 %v3000_v22 }
 0x2a7   : > { %v903_v1 = vpop.permute.xlu1 %902  ;;  %v901_v2 = vpop.permute.xlu0 %900 }
 0x2a8   : > { %2547 = vmatpush3.xpose.msk.msra.mxu1 %vm660_vm2, %v657_v62 }
 0x2a9   : > { %2548 = vmatprep.subr.mxu1 %v3000_v22 }
 0x2ab   : > { %v899_v3 = vpop.permute.xlu1 %898  ;;  %v893_v4 = vpop.permute.xlu0 %892 }
 0x2ac   : > { %2549 = vmatpush3.xpose.msk.msra.mxu1 %vm660_vm2, %v655_v63 }
 0x2ad   : > { %2574 = vmatprep.subr.mxu1 %v3000_v22 }
 0x2af   : > { %v895_v5 = vpop.permute.xlu1 %894  ;;  %2551 = vmatmul.mubr.msk.f32.vlgmr.msra.gmra.mxu1 %vm660_vm2, %v3225_v59  ;;  %v897_v6 = vpop.permute.xlu0 %896 }
 0x2b0   : > { %2575 = vmatpush3.xpose.msk.msra.mxu1 %vm660_vm2, %v903_v1  ;;  %2553 = vmatprep.mubr.msk.f32.mxu1 %vm3001_vm1, %v3000_v22 }
 0x2b1   : > { %2576 = vmatprep.subr.mxu1 %v3000_v22 }
 0x2b3   : > { %v795_v7 = vpop.permute.xlu1 %794  ;;  %2554 = vmatmul.mubr.msk.f32.gmra.mxu1 %vm660_vm2, %v3230_v60  ;;  %v793_v8 = vpop.permute.xlu0 %792 }
 0x2b4   : > { %2560 = vmatpush3.msra.mxu0 %v795_v7  ;;  %2577 = vmatpush3.xpose.msk.msra.mxu1 %vm660_vm2, %v901_v2 }
 0x2b5   : > { %2561 = vmatprep.subr.mxu0 %v3000_v22  ;;  %2556 = vmatprep.mubr.msk.f32.mxu1 %vm3001_vm1, %v3000_v22 }
 0x2b6   : > { %2562 = vmatpush3.msra.mxu0 %v793_v8  ;;  %2578 = vmatprep.subr.mxu1 %v3000_v22 }
 0x2b7   : > { %v791_v9 = vpop.permute.xlu1 %790  ;;  %2557 = vmatmul.mubr.msk.f32.gmra.mxu1 %vm660_vm2, %v3233_v61  ;;  %2563 = vmatprep.subr.mxu0 %v3000_v22 }
 0x2b8   : > { %2564 = vmatpush3.msra.mxu0 %v791_v9  ;;  %2579 = vmatpush3.xpose.msk.msra.mxu1 %vm660_vm2, %v899_v3 }
 0x2b9   : > { %2580 = vmatprep.mubr.msk.f32.mxu1 %vm3001_vm1, %v3000_v22  ;;  %2589 = vmatprep.subr.mxu0 %v3000_v22 }
 0x2ba   : > { %2604 = vmatprep.subr.mxu1 %v3000_v22 }
 0x2bb   : > { %2581 = vmatmul.mubr.msk.f32.vlgmr.msra.gmra.mxu1 %vm660_vm2, %v893_v4  ;;  %v1034_v38 = vpop.permute.xlu1 %1033 }
 0x2bc   : > { %2583 = vmatprep.mubr.msk.f32.mxu1 %vm3001_vm1, %v3000_v22 }
 0x2bf   : > { %2584 = vmatmul.mubr.msk.f32.gmra.mxu1 %vm660_vm2, %v895_v5 }
 0x2c0   : > { %2586 = vmatprep.mubr.msk.f32.mxu1 %vm3001_vm1, %v3000_v22 }
 0x2c3   : > { %2587 = vmatmul.mubr.msk.f32.gmra.mxu1 %vm660_vm2, %v897_v6 }
 0x2c4   : > { %2606 = vmatprep.mubr.msk.f32.mxu1 %vm3001_vm1, %v3000_v22 }
 0x36f   : > { %v742_v11 = vpop.f32.mrf.mxu1 }
 0x370   : > { %v743_v12 = vadd.f32 %v742_v11, %v3278_v10  ;;  %v1130_v11 = vld [vmem:[%s3670_s6 + $0x8] sm:$0xff] }
 0x371   : > { %v2552_v13 = vpop.f32.mrf.mxu1  ;;  %2605 = vmatpush3.msra.mxu1 %v1130_v11 }
 0x372   : > { %v757_v15 = vsel %vm756_vm3, %v743_v12, -inf  ;;  %2626 = vmatprep.subr.mxu1 %v3000_v22 }
 0x373   : > { %758 = vmax.xlane.f32.xlu1 %v757_v15  ;;  %v747_v16 = vpop.f32.mrf.mxu1 }
 0x374   : > { %v748_v17 = vadd.f32 %v747_v16, %v3281_v14  ;;  %v891_v16 = vld [vmem:[%s3670_s6] sm:$0xff] }
 0x375   : > { %v2555_v18 = vpop.f32.mrf.mxu1 }
 0x376   : > { %v760_v20 = vsel %vm756_vm3, %v748_v17, -inf }
 0x377   : > { %761 = vmax.xlane.f32.xlu0 %v760_v20  ;;  %v752_v21 = vpop.f32.mrf.mxu1 }
 0x378   : > { %v753_v23 = vadd.f32 %v752_v21, %v3285_v19 }
 0x379   : > { %v2558_v24 = vpop.f32.mrf.mxu1 }
 0x37a   : > { %v763_v25 = vsel %vm756_vm3, %v753_v23, -inf }
 0x37b   : > { %764 = vmax.xlane.f32.xlu0 %v763_v25  ;;  %v982_v26 = vpop.f32.mrf.mxu1 }
 0x37c   : > { %v983_v27 = vadd.f32 %v982_v26, %v3278_v10 }
 0x37d   : > { %v2582_v28 = vpop.f32.mrf.mxu1 }
 0x37e   : > { %v996_v29 = vsel %vm756_vm3, %v983_v27, -inf }
 0x37f   : > { %997 = vmax.xlane.f32.xlu0 %v996_v29  ;;  %v987_v30 = vpop.f32.mrf.mxu1 }
 0x380   : > { %v988_v31 = vadd.f32 %v987_v30, %v3281_v14 }
 0x381   : > { %v2585_v32 = vpop.f32.mrf.mxu1 }
 0x382   : > { %v999_v33 = vsel %vm756_vm3, %v988_v31, -inf }
 0x383   : > { %1000 = vmax.xlane.f32.xlu1 %v999_v33  ;;  %v992_v34 = vpop.f32.mrf.mxu1 }
 0x384   : > { %v993_v35 = vadd.f32 %v992_v34, %v3285_v19 }
 0x385   : > { %v2588_v36 = vpop.f32.mrf.mxu1 }
 0x386   : > { %v1002_v37 = vsel %vm756_vm3, %v993_v35, -inf }
 0x387   : > { %1003 = vmax.xlane.f32.xlu0 %v1002_v37 }
 0x394   : > { %1031 = vrot.lane.b32.xlu1 %v3213_v53, %s3006_s15 }
 0x39d   : > { %1029 = vrot.lane.b32.xlu0 %v3216_v56, %s3006_s15  ;;  %s3011_s15 = smov 104  }
 0x3fc   : > { %v759_v39 = vpop.xlane.xlu1 %758 }
 0x3fd   : > { %v766_v40 = vsub.f32 %v743_v12, %v759_v39 }
 0x3ff   : > { %v769_v41 = vmul.f32 1.442695, %v766_v40 }
 0x400   : > { %v762_v42 = vpop.xlane.xlu0 %761 }
 0x401   : > { %2842 = vpow2.f32 %v769_v41  ;;  %v767_v43 = vsub.f32 %v748_v17, %v762_v42 }
 0x403   : > { %v771_v44 = vmul.f32 1.442695, %v767_v43 }
 0x404   : > { %v765_v45 = vpop.xlane.xlu0 %764 }
 0x405   : > { %2844 = vpow2.f32 %v771_v44  ;;  %v768_v46 = vsub.f32 %v753_v23, %v765_v45 }
 0x407   : > { %v773_v47 = vmul.f32 1.442695, %v768_v46 }
 0x408   : > { %v998_v48 = vpop.xlane.xlu0 %997 }
 0x409   : > { %2846 = vpow2.f32 %v773_v47  ;;  %v1005_v49 = vsub.f32 %v983_v27, %v998_v48 }
 0x40b   : > { %v1008_v50 = vmul.f32 1.442695, %v1005_v49 }
 0x40c   : > { %v1001_v51 = vpop.xlane.xlu1 %1000 }
 0x40d   : > { %2848 = vpow2.f32 %v1008_v50  ;;  %v1006_v52 = vsub.f32 %v988_v31, %v1001_v51 }
 0x40e   : > { %v2843_v54 = vpop.eup %2842 }
 0x40f   : > { %v1010_v55 = vmul.f32 1.442695, %v1006_v52  ;;  %2566 = vmatmul.mubr.msk.f32.vlgmr.msra.gmra.mxu0 %vm756_vm3, %v2843_v54  ;;  %v775_v13 = vsel %vm756_vm3, %v2843_v54, 0.0 }
 0x410   : > { %2590 = vmatpush3.msra.mxu0 %v1034_v38  ;;  %v1032_v58 = vpop.permute.xlu1 %1031  ;;  %v1004_v62 = vpop.xlane.xlu0 %1003  ;;  %2568 = vmatprep.mubr.msk.f32.mxu0 %vm3001_vm1, %v3000_v22 }
 0x411   : > { %2850 = vpow2.f32 %v1010_v55  ;;  %2591 = vmatprep.subr.mxu0 %v3000_v22  ;;  %v1007_v63 = vsub.f32 %v993_v35, %v1004_v62 }
 0x412   : > { %v2845_v0 = vpop.eup %2844  ;;  %2592 = vmatpush3.msra.mxu0 %v1032_v58 }
 0x413   : > { %v1012_v1 = vmul.f32 1.442695, %v1007_v63  ;;  %2569 = vmatmul.mubr.msk.f32.gmra.mxu0 %vm756_vm3, %v2845_v0  ;;  %2593 = vmatprep.subr.mxu0 %v3000_v22  ;;  %v778_v12 = vsel %vm756_vm3, %v2845_v0, 0.0 }
 0x414   : > { %v1030_v2 = vpop.permute.xlu0 %1029  ;;  %2571 = vmatprep.mubr.msk.f32.mxu0 %vm3001_vm1, %v3000_v22 }
 0x415   : > { %2852 = vpow2.f32 %v1012_v1  ;;  %2594 = vmatpush3.msra.mxu0 %v1030_v2 }
 0x416   : > { %v2847_v3 = vpop.eup %2846  ;;  %2615 = vmatprep.subr.mxu0 %v3000_v22 }
 0x417   : > { %2572 = vmatmul.mubr.msk.f32.gmra.mxu0 %vm756_vm3, %v2847_v3  ;;  %v781_v15 = vsel %vm756_vm3, %v2847_v3, 0.0 }
 0x418   : > { %2595 = vmatprep.mubr.msk.f32.mxu0 %vm3001_vm1, %v3000_v22 }
 0x41a   : > { %v2849_v4 = vpop.eup %2848 }
 0x41b   : > { %2596 = vmatmul.mubr.msk.f32.vlgmr.msra.gmra.mxu0 %vm756_vm3, %v2849_v4  ;;  %v1014_v5 = vsel %vm756_vm3, %v2849_v4, 0.0 }
 0x41c   : > { %1015 = vadd.xlane.f32.xlu1 %v1014_v5  ;;  %2598 = vmatprep.mubr.msk.f32.mxu0 %vm3001_vm1, %v3000_v22 }
 0x41d   : > { %2616 = vmatpush3.msra.mxu0 %v891_v16 }
 0x41e   : > { %v2851_v6 = vpop.eup %2850  ;;  %2641 = vmatprep.subr.mxu0 %v3000_v22 }
 0x41f   : > { %2599 = vmatmul.mubr.msk.f32.gmra.mxu0 %vm756_vm3, %v2851_v6  ;;  %v1017_v7 = vsel %vm756_vm3, %v2851_v6, 0.0 }
 0x420   : > { %1018 = vadd.xlane.f32.xlu0 %v1017_v7  ;;  %2601 = vmatprep.mubr.msk.f32.mxu0 %vm3001_vm1, %v3000_v22 }
 0x422   : > { %v2853_v8 = vpop.eup %2852 }
 0x423   : > { %2602 = vmatmul.mubr.msk.f32.gmra.mxu0 %vm756_vm3, %v2853_v8  ;;  %v1020_v9 = vsel %vm756_vm3, %v2853_v8, 0.0 }
 0x424   : > { %1021 = vadd.xlane.f32.xlu0 %v1020_v9  ;;  %2617 = vmatprep.mubr.msk.f32.mxu0 %vm3001_vm1, %v3000_v22 }
 0x42d   : > { %1317 = vrot.lane.b32.xlu1 %v3213_v53, %s3007_s19 }
 0x431   : > { %1315 = vrot.lane.b32.xlu1 %v3216_v56, %s3007_s19 }
 0x435   : > { %1309 = vrot.lane.b32.xlu1 %v3225_v59, %s3008_s25 }
 0x439   : > { %1313 = vrot.lane.b32.xlu1 %v3233_v61, %s3008_s25 }
 0x43a   : > { %1319 = vrot.lane.b32.xlu0 %v3218_v57, %s3007_s19  ;;  %s3012_s19 = smov 40  }
 0x43e   : > { %1311 = vrot.lane.b32.xlu0 %v3230_v60, %s3008_s25 }
 0x45d   : > { %779 = vadd.xlane.f32.xlu1 %v778_v12  ;;  %776 = vadd.xlane.f32.xlu0 %v775_v13 }
 0x461   : > { %782 = vadd.xlane.f32.xlu0 %v781_v15 }
 0x46e   : > { %1448 = vrot.lane.b32.xlu1 %v3213_v53, %s3009_s20 }
 0x472   : > { %1446 = vrot.lane.b32.xlu1 %v3216_v56, %s3009_s20 }
 0x476   : > { %1650 = vrot.lane.b32.xlu1 %v3218_v57, %s3010_s28 }
 0x477   : > { %1450 = vrot.lane.b32.xlu0 %v3218_v57, %s3009_s20  ;;  %s2766_s20 = smul.u32 24, %s473_s18 }
 0x4a5   : > { %v1016_v17 = vpop.xlane.xlu1 %1015 }
 0x4a6   : > { %2854 = vrcp.f32 %v1016_v17 }
 0x4a9   : > { %v1019_v18 = vpop.xlane.xlu0 %1018  ;;  %v1318_v21 = vpop.permute.xlu1 %1317 }
 0x4aa   : > { %2856 = vrcp.f32 %v1019_v18 }
 0x4ad   : > { %v1022_v24 = vpop.xlane.xlu0 %1021  ;;  %v1316_v27 = vpop.permute.xlu1 %1315 }
 0x4ae   : > { %2858 = vrcp.f32 %v1022_v24 }
 0x4b1   : > { %v1320_v32 = vpop.permute.xlu0 %1319  ;;  %v1310_v34 = vpop.permute.xlu1 %1309 }
 0x4b3   : > { %v2855_v30 = vpop.eup %2854 }
 0x4b5   : > { %v1312_v40 = vpop.permute.xlu0 %1311  ;;  %v1314_v42 = vpop.permute.xlu1 %1313 }
 0x4b7   : > { %v2857_v36 = vpop.eup %2856 }
 0x4bb   : > { %v2859_v41 = vpop.eup %2858 }
 0x4cf   : > { %v874_v20 = vpop.f32.mrf.mxu0 }
 0x4d1   : > { %v2567_v23 = vpop.f32.mrf.mxu0 }
 0x4d3   : > { %v879_v25 = vpop.f32.mrf.mxu0 }
 0x4d5   : > { %v2570_v26 = vpop.f32.mrf.mxu0 }
 0x4d7   : > { %v884_v28 = vpop.f32.mrf.mxu0 }
 0x4d9   : > { %v2573_v29 = vpop.f32.mrf.mxu0 }
 0x4db   : > { %v1113_v31 = vpop.f32.mrf.mxu0 }
 0x4dc   : > { %v1127_v33 = vmul.f32 %v2855_v30, %v1113_v31 }
 0x4dd   : > { %v2597_v35 = vpop.f32.mrf.mxu0 }
 0x4de   : > { %2607 = vmatmul.mubr.msk.f32.vlgmr.msra.gmra.mxu1 %vm660_vm2, %v1127_v33 }
 0x4df   : > { %2627 = vmatpush3.xpose.msk.msra.mxu1 %vm660_vm2, %v1320_v32  ;;  %v1118_v37 = vpop.f32.mrf.mxu0  ;;  %2609 = vmatprep.mubr.msk.f32.mxu1 %vm3001_vm1, %v3000_v22 }
 0x4e0   : > { %v1128_v38 = vmul.f32 %v2857_v36, %v1118_v37  ;;  %2628 = vmatprep.subr.mxu1 %v3000_v22 }
 0x4e1   : > { %v2600_v39 = vpop.f32.mrf.mxu0 }
 0x4e2   : > { %2610 = vmatmul.mubr.msk.f32.gmra.mxu1 %vm660_vm2, %v1128_v38 }
 0x4e3   : > { %2629 = vmatpush3.xpose.msk.msra.mxu1 %vm660_vm2, %v1318_v21  ;;  %v1123_v43 = vpop.f32.mrf.mxu0  ;;  %2612 = vmatprep.mubr.msk.f32.mxu1 %vm3001_vm1, %v3000_v22 }
 0x4e4   : > { %v1129_v44 = vmul.f32 %v2859_v41, %v1123_v43  ;;  %2630 = vmatprep.subr.mxu1 %v3000_v22 }
 0x4e5   : > { %v2603_v45 = vpop.f32.mrf.mxu0 }
 0x4e6   : > { %2613 = vmatmul.mubr.msk.f32.gmra.mxu1 %vm660_vm2, %v1129_v44  ;;  %v777_v46 = vpop.xlane.xlu0 %776  ;;  %v780_v47 = vpop.xlane.xlu1 %779 }
 0x4e7   : > { %2631 = vmatpush3.xpose.msk.msra.mxu1 %vm660_vm2, %v1316_v27  ;;  %2632 = vmatprep.mubr.msk.f32.mxu1 %vm3001_vm1, %v3000_v22  ;;  %2860 = vrcp.f32 %v777_v46 }
 0x4e8   : > { %2656 = vmatprep.subr.mxu1 %v3000_v22  ;;  %2862 = vrcp.f32 %v780_v47 }
 0x4ea   : > { %2633 = vmatmul.mubr.msk.f32.vlgmr.msra.gmra.mxu1 %vm660_vm2, %v1310_v34  ;;  %v783_v48 = vpop.xlane.xlu0 %782  ;;  %v1449_v51 = vpop.permute.xlu1 %1448 }
 0x4eb   : > { %2635 = vmatprep.mubr.msk.f32.mxu1 %vm3001_vm1, %v3000_v22  ;;  %2864 = vrcp.f32 %v783_v48  ;;  %v1547_v48 = vld [vmem:[%s3670_s6 + $0x10] sm:$0xff] }
 0x4ec   : > { %2657 = vmatpush3.msra.mxu1 %v1547_v48 }
 0x4ed   : > { %2682 = vmatprep.subr.mxu1 %v3000_v22 }
 0x4ee   : > { %2636 = vmatmul.mubr.msk.f32.gmra.mxu1 %vm660_vm2, %v1312_v40  ;;  %v1451_v54 = vpop.permute.xlu0 %1450  ;;  %v1447_v62 = vpop.permute.xlu1 %1446 }
 0x4ef   : > { %2638 = vmatprep.mubr.msk.f32.mxu1 %vm3001_vm1, %v3000_v22 }
 0x4f2   : > { %2639 = vmatmul.mubr.msk.f32.gmra.mxu1 %vm660_vm2, %v1314_v42  ;;  %v1651_v34 = vpop.permute.xlu1 %1650 }
 0x4f3   : > { %2658 = vmatprep.mubr.msk.f32.mxu1 %vm3001_vm1, %v3000_v22 }
 0x4f4   : > { %v2861_v49 = vpop.eup %2860 }
 0x4f5   : > { %v888_v50 = vmul.f32 %v2861_v49, %v874_v20  ;;  %v2863_v52 = vpop.eup %2862 }
 0x4f6   : > { %v889_v55 = vmul.f32 %v2863_v52, %v879_v25 }
 0x4f7   : > { %2618 = vmatmul.mubr.msk.f32.vlgmr.msra.gmra.mxu0 %vm660_vm2, %v888_v50 }
 0x4f8   : > { %2642 = vmatpush3.msra.mxu0 %v1451_v54  ;;  %2620 = vmatprep.mubr.msk.f32.mxu0 %vm3001_vm1, %v3000_v22  ;;  %v2865_v58 = vpop.eup %2864 }
 0x4f9   : > { %2643 = vmatprep.subr.mxu0 %v3000_v22  ;;  %v890_v63 = vmul.f32 %v2865_v58, %v884_v28 }
 0x4fa   : > { %2644 = vmatpush3.msra.mxu0 %v1449_v51 }
 0x4fb   : > { %2645 = vmatprep.subr.mxu0 %v3000_v22  ;;  %2621 = vmatmul.mubr.msk.f32.gmra.mxu0 %vm660_vm2, %v889_v55 }
 0x4fc   : > { %2646 = vmatpush3.msra.mxu0 %v1447_v62  ;;  %2623 = vmatprep.mubr.msk.f32.mxu0 %vm3001_vm1, %v3000_v22 }
 0x4fd   : > { %2667 = vmatprep.subr.mxu0 %v3000_v22 }
 0x4ff   : > { %2624 = vmatmul.mubr.msk.f32.gmra.mxu0 %vm660_vm2, %v890_v63 }
 0x500   : > { %2647 = vmatprep.mubr.msk.f32.mxu0 %vm3001_vm1, %v3000_v22 }
 0x59e   : > { %v1206_v0 = vpop.f32.mrf.mxu1 }
 0x5a0   : > { %v2608_v1 = vpop.f32.mrf.mxu1 }
 0x5a2   : > { %v1211_v2 = vpop.f32.mrf.mxu1 }
 0x5a4   : > { %v2611_v3 = vpop.f32.mrf.mxu1 }
 0x5a6   : > { %v1216_v4 = vpop.f32.mrf.mxu1 }
 0x5a8   : > { %v2614_v5 = vpop.f32.mrf.mxu1 }
 0x5aa   : > { %v1399_v6 = vpop.f32.mrf.mxu1 }
 0x5ab   : > { %v1400_v7 = vadd.f32 %v1399_v6, %v3278_v10 }
 0x5ac   : > { %v2634_v8 = vpop.f32.mrf.mxu1 }
 0x5ad   : > { %v1413_v9 = vsel %vm756_vm3, %v1400_v7, -inf }
 0x5ae   : > { %1414 = vmax.xlane.f32.xlu0 %v1413_v9  ;;  %v1404_v11 = vpop.f32.mrf.mxu1 }
 0x5af   : > { %v1405_v12 = vadd.f32 %v1404_v11, %v3281_v14 }
 0x5b0   : > { %v2637_v13 = vpop.f32.mrf.mxu1 }
 0x5b1   : > { %v1416_v15 = vsel %vm756_vm3, %v1405_v12, -inf }
 0x5b2   : > { %1417 = vmax.xlane.f32.xlu0 %v1416_v15  ;;  %v1409_v16 = vpop.f32.mrf.mxu1 }
 0x5b3   : > { %v1410_v17 = vadd.f32 %v1409_v16, %v3285_v19 }
 0x5b4   : > { %v2640_v18 = vpop.f32.mrf.mxu1 }
 0x5b5   : > { %v1419_v20 = vsel %vm756_vm3, %v1410_v17, -inf }
 0x5b6   : > { %1420 = vmax.xlane.f32.xlu1 %v1419_v20 }
 0x5b7   : > { %v1295_v21 = vpop.f32.mrf.mxu0 }
 0x5b8   : > { %v3388_v23 = vadd.f32 %v1295_v21, %v1206_v0 }
 0x5b9   : > { %v2619_v24 = vpop.f32.mrf.mxu0 }
 0x5bb   : > { %v1300_v25 = vpop.f32.mrf.mxu0 }
 0x5bc   : > { %v3390_v26 = vadd.f32 %v1300_v25, %v1211_v2 }
 0x5bd   : > { %v2622_v27 = vpop.f32.mrf.mxu0 }
 0x5bf   : > { %v1305_v28 = vpop.f32.mrf.mxu0 }
 0x5c0   : > { %v3392_v29 = vadd.f32 %v1305_v28, %v1216_v4 }
 0x5c1   : > { %v2625_v30 = vpop.f32.mrf.mxu0 }
 0x5c7   : > { %1646 = vrot.lane.b32.xlu1 %v3216_v56, %s3010_s28 }
 0x5c8   : > { %1648 = vrot.lane.b32.xlu0 %v3213_v53, %s3010_s28 }
 0x5cb   : > { %1642 = vrot.lane.b32.xlu1 %v3230_v60, %s3011_s15 }
 0x5cc   : > { %1640 = vrot.lane.b32.xlu0 %v3225_v59, %s3011_s15 }
 0x5cf   : > { %1781 = vrot.lane.b32.xlu1 %v3218_v57, %s3012_s19 }
 0x5d0   : > { %1644 = vrot.lane.b32.xlu0 %v3233_v61, %s3011_s15  ;;  %s2768_s15 = smul.u32 384, %s3112_s17  ;;  %s3624_s17 = scalar_lea.sflag [#allocation4], %s473_s18 }
 0x5d2   : > { %s3621_s27 = scalar_lea.hbm %s3678_s14, %s2768_s15 }
 0x637   : > { %v1415_v31 = vpop.xlane.xlu0 %1414 }
 0x638   : > { %v1422_v32 = vsub.f32 %v1400_v7, %v1415_v31 }
 0x63a   : > { %v1425_v33 = vmul.f32 1.442695, %v1422_v32 }
 0x63b   : > { %v1418_v35 = vpop.xlane.xlu0 %1417 }
 0x63c   : > { %2866 = vpow2.f32 %v1425_v33  ;;  %v1423_v36 = vsub.f32 %v1405_v12, %v1418_v35 }
 0x63e   : > { %v1427_v37 = vmul.f32 1.442695, %v1423_v36 }
 0x63f   : > { %v1421_v38 = vpop.xlane.xlu1 %1420  ;;  %v1649_v40 = vpop.permute.xlu0 %1648 }
 0x640   : > { %2868 = vpow2.f32 %v1427_v37  ;;  %v1424_v39 = vsub.f32 %v1410_v17, %v1421_v38  ;;  %v1878_v38 = vld [vmem:[%s3670_s6 + $0x18] sm:$0xff] }
 0x642   : > { %v1429_v60 = vmul.f32 1.442695, %v1424_v39 }
 0x643   : > { %v1647_v43 = vpop.permute.xlu1 %1646  ;;  %v1641_v45 = vpop.permute.xlu0 %1640 }
 0x644   : > { %2870 = vpow2.f32 %v1429_v60 }
 0x647   : > { %v1643_v46 = vpop.permute.xlu1 %1642  ;;  %v1645_v47 = vpop.permute.xlu0 %1644 }
 0x649   : > { %v2867_v59 = vpop.eup %2866 }
 0x64a   : > { %2648 = vmatmul.mubr.msk.f32.vlgmr.msra.gmra.mxu0 %vm756_vm3, %v2867_v59  ;;  %v1431_v57 = vsel %vm756_vm3, %v2867_v59, 0.0 }
 0x64b   : > { %2668 = vmatpush3.xpose.msk.msra.mxu0 %vm660_vm2, %v1651_v34  ;;  %1432 = vadd.xlane.f32.xlu1 %v1431_v57  ;;  %v1782_v49 = vpop.permute.xlu1 %1781 }
 0x64c   : > { %2650 = vmatprep.mubr.msk.f32.mxu0 %vm3001_vm1, %v3000_v22  ;;  %2669 = vmatprep.subr.mxu0 %v3000_v22 }
 0x64d   : > { %v2869_v61 = vpop.eup %2868 }
 0x64e   : > { %2651 = vmatmul.mubr.msk.f32.gmra.mxu0 %vm756_vm3, %v2869_v61  ;;  %v1434_v41 = vsel %vm756_vm3, %v2869_v61, 0.0 }
 0x64f   : > { %2670 = vmatpush3.xpose.msk.msra.mxu0 %vm660_vm2, %v1649_v40  ;;  %1435 = vadd.xlane.f32.xlu0 %v1434_v41 }
 0x650   : > { %2653 = vmatprep.mubr.msk.f32.mxu0 %vm3001_vm1, %v3000_v22  ;;  %2671 = vmatprep.subr.mxu0 %v3000_v22 }
 0x651   : > { %v2871_v42 = vpop.eup %2870 }
 0x652   : > { %2654 = vmatmul.mubr.msk.f32.gmra.mxu0 %vm756_vm3, %v2871_v42  ;;  %v1437_v44 = vsel %vm756_vm3, %v2871_v42, 0.0 }
 0x653   : > { %2672 = vmatpush3.xpose.msk.msra.mxu0 %vm660_vm2, %v1647_v43  ;;  %1438 = vadd.xlane.f32.xlu0 %v1437_v44 }
 0x654   : > { %2673 = vmatprep.mubr.msk.f32.mxu0 %vm3001_vm1, %v3000_v22  ;;  %2697 = vmatprep.subr.mxu0 %v3000_v22 }
 0x656   : > { %2674 = vmatmul.mubr.msk.f32.vlgmr.msra.gmra.mxu0 %vm660_vm2, %v1641_v45 }
 0x657   : > { %2676 = vmatprep.mubr.msk.f32.mxu0 %vm3001_vm1, %v3000_v22  ;;  %2698 = vmatpush3.msra.mxu0 %v1878_v38  ;;  %v2046_v38 = vld [vmem:[%s3674_s10 + $0x10] sm:$0xff] }
 0x658   : > { %2725 = vmatprep.subr.mxu0 %v3000_v22 }
 0x65a   : > { %2677 = vmatmul.mubr.msk.f32.gmra.mxu0 %vm660_vm2, %v1643_v46 }
 0x65b   : > { %2679 = vmatprep.mubr.msk.f32.mxu0 %vm3001_vm1, %v3000_v22 }
 0x65e   : > { %2680 = vmatmul.mubr.msk.f32.gmra.mxu0 %vm660_vm2, %v1645_v47 }
 0x65f   : > { %2699 = vmatprep.mubr.msk.f32.mxu0 %vm3001_vm1, %v3000_v22 }
 0x6d4   : > { %v1433_v50 = vpop.xlane.xlu1 %1432 }
 0x6d5   : > { %2872 = vrcp.f32 %v1433_v50 }
 0x6d8   : > { %v1436_v51 = vpop.xlane.xlu0 %1435 }
 0x6d9   : > { %2874 = vrcp.f32 %v1436_v51 }
 0x6dc   : > { %v1439_v52 = vpop.xlane.xlu0 %1438 }
 0x6dd   : > { %2876 = vrcp.f32 %v1439_v52 }
 0x6e2   : > { %v2873_v54 = vpop.eup %2872 }
 0x6e6   : > { %v2875_v63 = vpop.eup %2874 }
 0x6ea   : > { %v2877_v3 = vpop.eup %2876 }
 0x70a   : > { %v1530_v55 = vpop.f32.mrf.mxu0 }
 0x70b   : > { %v1544_v58 = vmul.f32 %v2873_v54, %v1530_v55 }
 0x70c   : > { %v2649_v62 = vpop.f32.mrf.mxu0 }
 0x70d   : > { %2659 = vmatmul.mubr.msk.f32.vlgmr.msra.gmra.mxu1 %vm660_vm2, %v1544_v58 }
 0x70e   : > { %2683 = vmatpush3.msra.mxu1 %v1782_v49  ;;  %v1535_v0 = vpop.f32.mrf.mxu0  ;;  %2661 = vmatprep.mubr.msk.f32.mxu1 %vm3001_vm1, %v3000_v22 }
 0x70f   : > { %v1545_v1 = vmul.f32 %v2875_v63, %v1535_v0  ;;  %2684 = vmatprep.subr.mxu1 %v3000_v22  ;;  %v2419_v0 = vld [vmem:[%s3671_s7] ss:$0 sm:$0xff] }
 0x710   : > { %v2652_v2 = vpop.f32.mrf.mxu0 }
 0x711   : > { %2662 = vmatmul.mubr.msk.f32.gmra.mxu1 %vm660_vm2, %v1545_v1  ;;  %v2902_v2 = vld [vmem:[%s3162_s22] sm:$0xff] }
 0x712   : > { %v1540_v4 = vpop.f32.mrf.mxu0  ;;  %2664 = vmatprep.mubr.msk.f32.mxu1 %vm3001_vm1, %v3000_v22 }
 0x713   : > { %v1546_v5 = vmul.f32 %v2877_v3, %v1540_v4 }
 0x714   : > { %v2655_v6 = vpop.f32.mrf.mxu0 }
 0x715   : > { %2665 = vmatmul.mubr.msk.f32.gmra.mxu1 %vm660_vm2, %v1546_v5 }
 0x716   : > { %v1730_v7 = vpop.f32.mrf.mxu0  ;;  %2688 = vmatprep.mubr.msk.f32.mxu1 %vm3001_vm1, %v3000_v22 }
 0x717   : > { %v1731_v8 = vadd.f32 %v1730_v7, %v3278_v10 }
 0x718   : > { %v2675_v9 = vpop.f32.mrf.mxu0 }
 0x719   : > { %v1744_v11 = vsel %vm756_vm3, %v1731_v8, -inf }
 0x71a   : > { %1745 = vmax.xlane.f32.xlu0 %v1744_v11  ;;  %v1735_v12 = vpop.f32.mrf.mxu0 }
 0x71b   : > { %v1736_v13 = vadd.f32 %v1735_v12, %v3281_v14 }
 0x71c   : > { %v2678_v15 = vpop.f32.mrf.mxu0 }
 0x71d   : > { %v1747_v16 = vsel %vm756_vm3, %v1736_v13, -inf }
 0x71e   : > { %1748 = vmax.xlane.f32.xlu1 %v1747_v16  ;;  %v1740_v17 = vpop.f32.mrf.mxu0 }
 0x71f   : > { %v1741_v18 = vadd.f32 %v1740_v17, %v3285_v19  ;;  %v2904_v17 = vld [vmem:[%s3162_s22 + $0x10] sm:$0xff] }
 0x720   : > { %v2681_v20 = vpop.f32.mrf.mxu0 }
 0x721   : > { %v1750_v21 = vsel %vm756_vm3, %v1741_v18, -inf }
 0x722   : > { %1751 = vmax.xlane.f32.xlu0 %v1750_v21 }
 0x72f   : > { %1777 = vrot.lane.b32.xlu1 %v3216_v56, %s3012_s19 }
 0x738   : > { %1779 = vrot.lane.b32.xlu0 %v3213_v53, %s3012_s19 }
 0x7a3   : > { %v1746_v10 = vpop.xlane.xlu0 %1745 }
 0x7a4   : > { %v1753_v24 = vsub.f32 %v1731_v8, %v1746_v10  ;;  %v2903_v8 = vld [vmem:[%s3162_s22 + $0x8] sm:$0xff]  ;;  %s475_s22 = scalar_lea.vmem [#allocation5], %s2766_s20 }
 0x7a5   : > { %s2284_s28 = sshll.u32 %s475_s22, 4  ;;  %s3616_s28 = int_to_ptr.vmem [resolvable:$true] %s2284_s28 }
 0x7a6   : > { %v1756_v14 = vmul.f32 1.442695, %v1753_v24  ;;  %s2931_s20 = scalar_lea.vmem %s3616_s28, 384  ;;  %p2938_p11 = scmp.lt.s32.totalorder %s3616_s28, %s2936_s26 }
 0x7a7   : > { %v1749_v25 = vpop.xlane.xlu1 %1748  ;;  %p2932_p6 = scmp.ne.s32.totalorder %s3616_s28, %s2931_s20  ;;  %p2939_p12 = scmp.lt.s32.totalorder %s2937_s0, %s2931_s20 }
 0x7a8   : > { %2878 = vpow2.f32 %v1756_v14  ;;  %v1754_v27 = vsub.f32 %v1736_v13, %v1749_v25 }
 0x7a9   : > { %p2933_p9 = pnand %p2932_p6, %p3129_p5  ;;  %p2940_p13 = por %p2939_p12, %p2938_p11 }
 0x7aa   : > { %v1758_v28 = vmul.f32 1.442695, %v1754_v27 }
 0x7ab   : > { %v1752_v30 = vpop.xlane.xlu0 %1751  ;;  %v1778_v33 = vpop.permute.xlu1 %1777  ;;  %p2934_p10 = pneg %p2933_p9 }
 0x7ac   : > { %2880 = vpow2.f32 %v1758_v28  ;;  %v1755_v19 = vsub.f32 %v1741_v18, %v1752_v30 }
 0x7ad   : > { %p2941_p0 = pnand %p2940_p13, %p2934_p10 }
 0x7ae   : > { %v1760_v31 = vmul.f32 1.442695, %v1755_v19 }
 0x7af   : > { %v1780_v32 = vpop.permute.xlu0 %1779 }
 0x7b0   : > { %2882 = vpow2.f32 %v1760_v31  ;;  %2685 = vmatpush3.msra.mxu1 %v1780_v32 }
 0x7b1   : > { %2686 = vmatprep.subr.mxu1 %v3000_v22 }
 0x7b2   : > { %2687 = vmatpush3.msra.mxu1 %v1778_v33 }
 0x7b3   : > { %2708 = vmatprep.subr.mxu1 %v3000_v22 }
 0x7b5   : > { %v2879_v53 = vpop.eup %2878 }
 0x7b6   : > { %2689 = vmatmul.mubr.msk.f32.vlgmr.msra.gmra.mxu1 %vm756_vm3, %v2879_v53  ;;  %v1762_v56 = vsel %vm756_vm3, %v2879_v53, 0.0 }
 0x7b7   : > { %1763 = vadd.xlane.f32.xlu1 %v1762_v56  ;;  %2691 = vmatprep.mubr.msk.f32.mxu1 %vm3001_vm1, %v3000_v22 }
 0x7b9   : > { %v2881_v34 = vpop.eup %2880 }
 0x7ba   : > { %2692 = vmatmul.mubr.msk.f32.gmra.mxu1 %vm756_vm3, %v2881_v34  ;;  %v1765_v35 = vsel %vm756_vm3, %v2881_v34, 0.0 }
 0x7bb   : > { %1766 = vadd.xlane.f32.xlu0 %v1765_v35  ;;  %2694 = vmatprep.mubr.msk.f32.mxu1 %vm3001_vm1, %v3000_v22 }
 0x7bd   : > { %v2883_v36 = vpop.eup %2882 }
 0x7be   : > { %2695 = vmatmul.mubr.msk.f32.gmra.mxu1 %vm756_vm3, %v2883_v36  ;;  %v1768_v37 = vsel %vm756_vm3, %v2883_v36, 0.0 }
 0x7bf   : > { %1769 = vadd.xlane.f32.xlu0 %v1768_v37  ;;  %2716 = vmatprep.mubr.msk.f32.mxu1 %vm3001_vm1, %v3000_v22  ;;  %v2047_v37 = vld [vmem:[%s3674_s10 + $0x18] sm:$0xff] }
 0x7c0   : > { %2709 = vmatpush3.msra.mxu1 %v2047_v37 }
 0x7c1   : > { %2710 = vmatprep.subr.mxu1 %v3000_v22 }
 0x7c2   : > { %2711 = vmatpush3.msra.mxu1 %v2046_v38 }
 0x7c3   : > { %2712 = vmatprep.subr.mxu1 %v3000_v22 }
 0x7cd   : > { %v1623_v39 = vpop.f32.mrf.mxu1 }
 0x7ce   : > { %v1637_v60 = vadd.f32 %v1623_v39, %v3388_v23  ;;  %v2045_v39 = vld [vmem:[%s3674_s10 + $0x8] sm:$0xff] }
 0x7cf   : > { %v2660_v59 = vpop.f32.mrf.mxu1  ;;  %2713 = vmatpush3.msra.mxu1 %v2045_v39 }
 0x7d0   : > { %2714 = vmatprep.subr.mxu1 %v3000_v22  ;;  %v2173_v59 = vld [vmem:[%s3676_s12 + $0x78] sm:$0xff] }
 0x7d1   : > { %v1628_v57 = vpop.f32.mrf.mxu1 }
 0x7d2   : > { %v1638_v61 = vadd.f32 %v1628_v57, %v3390_v26  ;;  %v2172_v57 = vld [vmem:[%s3676_s12 + $0x70] sm:$0xff] }
 0x7d3   : > { %v2663_v40 = vpop.f32.mrf.mxu1 }
 0x7d4   : > { %v2170_v40 = vld [vmem:[%s3676_s12 + $0x60] sm:$0xff] }
 0x7d5   : > { %v1633_v41 = vpop.f32.mrf.mxu1 }
 0x7d6   : > { %v1639_v42 = vadd.f32 %v1633_v41, %v3392_v29 }
 0x7d7   : > { %v2666_v43 = vpop.f32.mrf.mxu1 }
 0x840   : > { %v1764_v44 = vpop.xlane.xlu1 %1763 }
 0x841   : > { %2884 = vrcp.f32 %v1764_v44 }
 0x844   : > { %v1767_v45 = vpop.xlane.xlu0 %1766 }
 0x845   : > { %2886 = vrcp.f32 %v1767_v45 }
 0x848   : > { %v1770_v46 = vpop.xlane.xlu0 %1769 }
 0x849   : > { %2888 = vrcp.f32 %v1770_v46 }
 0x84e   : > { %v2885_v47 = vpop.eup %2884 }
 0x852   : > { %v2887_v23 = vpop.eup %2886 }
 0x856   : > { %v2889_v52 = vpop.eup %2888 }
 0x876   : > { %v1861_v48 = vpop.f32.mrf.mxu1 }
 0x877   : > { %v1875_v49 = vmul.f32 %v2885_v47, %v1861_v48 }
 0x878   : > { %v2690_v50 = vpop.f32.mrf.mxu1 }
 0x879   : > { %2700 = vmatmul.mubr.msk.f32.vlgmr.msra.gmra.mxu0 %vm660_vm2, %v1875_v49 }
 0x87a   : > { %v1866_v51 = vpop.f32.mrf.mxu1  ;;  %2702 = vmatprep.mubr.msk.f32.mxu0 %vm3001_vm1, %v3000_v22  ;;  %2726 = vmatpush3.msra.mxu0 %v2173_v59 }
 0x87b   : > { %v1876_v26 = vmul.f32 %v2887_v23, %v1866_v51  ;;  %2727 = vmatprep.subr.mxu0 %v3000_v22  ;;  %v2420_v23 = vld [vmem:[%s3672_s8] ss:$0 sm:$0xff] }
 0x87c   : > { %v2693_v29 = vpop.f32.mrf.mxu1  ;;  %2728 = vmatpush3.msra.mxu0 %v2172_v57 }
 0x87d   : > { %2703 = vmatmul.mubr.msk.f32.gmra.mxu0 %vm660_vm2, %v1876_v26  ;;  %2729 = vmatprep.subr.mxu0 %v3000_v22  ;;  %v2421_v26 = vld [vmem:[%s3673_s9] ss:$0 sm:$0xff] }
 0x87e   : > { %v1871_v54 = vpop.f32.mrf.mxu1  ;;  %2705 = vmatprep.mubr.msk.f32.mxu0 %vm3001_vm1, %v3000_v22 }
 0x87f   : > { %v1877_v55 = vmul.f32 %v2889_v52, %v1871_v54 }
 0x880   : > { %v2696_v58 = vpop.f32.mrf.mxu1 }
 0x881   : > { %2706 = vmatmul.mubr.msk.f32.gmra.mxu0 %vm660_vm2, %v1877_v55 }
 0x882   : > { %2757 = vmatprep.mubr.msk.f32.mxu0 %vm3001_vm1, %v3000_v22 }
 0x939   : > { %v1954_v62 = vpop.f32.mrf.mxu0 }
 0x93a   : > { %v1968_v63 = vadd.f32 %v1954_v62, %v1637_v60  ;;  %v2044_v60 = vld [vmem:[%s3674_s10] sm:$0xff] }
 0x93b   : > { %v2701_v1 = vpop.f32.mrf.mxu0  ;;  %2715 = vmatpush3.msra.mxu1 %v2044_v60 }
 0x93c   : > { %v1971_v3 = vadd.f32 %v2902_v2, %v1968_v63 }
 0x93d   : > { %v1959_v4 = vpop.f32.mrf.mxu0 }
 0x93e   : > { %v3488_v5 = vadd.f32 %v2419_v0, %v1971_v3  ;;  %v1969_v6 = vadd.f32 %v1959_v4, %v1638_v61  ;;  %v2171_v61 = vld [vmem:[%s3676_s12 + $0x68] sm:$0xff]  ;;  %v2169_v3 = vld [vmem:[%s3676_s12 + $0x58] sm:$0xff]  ;;  %v2168_v4 = vld [vmem:[%s3676_s12 + $0x50] sm:$0xff] }
 0x93f   : > { %v2704_v7 = vpop.f32.mrf.mxu0  ;;  %2730 = vmatpush3.msra.mxu0 %v2171_v61 }
 0x940   : > { %v1972_v9 = vadd.f32 %v2903_v8, %v1969_v6  ;;  %v1986_v11 = vsel %vm486_vm0, %v3488_v5, 0.0  ;;  %2731 = vmatprep.subr.mxu0 %v3000_v22  ;;  %v2167_v6 = vld [vmem:[%s3676_s12 + $0x48] sm:$0xff]  ;;  %v2166_v7 = vld [vmem:[%s3676_s12 + $0x40] sm:$0xff]  ;;  %v2165_v8 = vld [vmem:[%s3676_s12 + $0x38] sm:$0xff] }
 0x941   : > { %1987 = vadd.xlane.f32.xlu1 %v1986_v11  ;;  %v1964_v12 = vpop.f32.mrf.mxu0  ;;  %2732 = vmatpush3.msra.mxu0 %v2170_v40  ;;  %v2163_v11 = vld [vmem:[%s3676_s12 + $0x28] sm:$0xff] }
 0x942   : > { %v3493_v13 = vadd.f32 %v2419_v0, %v1972_v9  ;;  %v1970_v15 = vadd.f32 %v1964_v12, %v1639_v42  ;;  %2733 = vmatprep.subr.mxu0 %v3000_v22  ;;  %v2164_v9 = vld [vmem:[%s3676_s12 + $0x30] sm:$0xff]  ;;  %v2162_v12 = vld [vmem:[%s3676_s12 + $0x20] sm:$0xff] }
 0x943   : > { %v2707_v16 = vpop.f32.mrf.mxu0  ;;  %2734 = vmatpush3.msra.mxu0 %v2169_v3 }
 0x944   : > { %v1973_v18 = vadd.f32 %v2904_v17, %v1970_v15  ;;  %v1989_v20 = vsel %vm486_vm0, %v3493_v13, 0.0  ;;  %2735 = vmatprep.subr.mxu0 %v3000_v22  ;;  %v2161_v15 = vld [vmem:[%s3676_s12 + $0x18] sm:$0xff]  ;;  %v2160_v16 = vld [vmem:[%s3676_s12 + $0x10] sm:$0xff]  ;;  %v2159_v17 = vld [vmem:[%s3676_s12 + $0x8] sm:$0xff] }
 0x945   : > { %1990 = vadd.xlane.f32.xlu0 %v1989_v20  ;;  %2736 = vmatpush3.msra.mxu0 %v2168_v4  ;;  %v2422_v20 = vld [vmem:[%s3675_s11] ss:$0 sm:$0xff] }
 0x946   : > { %v3498_v21 = vadd.f32 %v2419_v0, %v1973_v18  ;;  %2737 = vmatprep.subr.mxu0 %v3000_v22  ;;  %v2158_v18 = vld [vmem:[%s3676_s12] sm:$0xff] }
 0x947   : > { %2738 = vmatpush3.msra.mxu0 %v2167_v6 }
 0x948   : > { %v1992_v10 = vsel %vm486_vm0, %v3498_v21, 0.0  ;;  %2739 = vmatprep.subr.mxu0 %v3000_v22 }
 0x949   : > { %1993 = vadd.xlane.f32.xlu1 %v1992_v10  ;;  %2740 = vmatpush3.msra.mxu0 %v2166_v7 }
 0x94a   : > { %2741 = vmatprep.subr.mxu0 %v3000_v22 }
 0x94b   : > { %2742 = vmatpush3.msra.mxu0 %v2165_v8 }
 0x94c   : > { %2743 = vmatprep.subr.mxu0 %v3000_v22 }
 0x94d   : > { %2744 = vmatpush3.msra.mxu0 %v2164_v9 }
 0x94e   : > { %2745 = vmatprep.subr.mxu0 %v3000_v22 }
 0x94f   : > { %2746 = vmatpush3.msra.mxu0 %v2163_v11 }
 0x950   : > { %2747 = vmatprep.subr.mxu0 %v3000_v22 }
 0x951   : > { %2748 = vmatpush3.msra.mxu0 %v2162_v12 }
 0x952   : > { %2749 = vmatprep.subr.mxu0 %v3000_v22 }
 0x953   : > { %2750 = vmatpush3.msra.mxu0 %v2161_v15 }
 0x954   : > { %2751 = vmatprep.subr.mxu0 %v3000_v22 }
 0x955   : > { %2752 = vmatpush3.msra.mxu0 %v2160_v16 }
 0x956   : > { %2753 = vmatprep.subr.mxu0 %v3000_v22 }
 0x957   : > { %2754 = vmatpush3.msra.mxu0 %v2159_v17 }
 0x958   : > { %2755 = vmatprep.subr.mxu0 %v3000_v22 }
 0x959   : > { %2756 = vmatpush3.msra.mxu0 %v2158_v18 }
 0x9ca   : > { %v1988_v24 = vpop.xlane.xlu1 %1987 }
 0x9cb   : > { %v1995_v14 = vmul.f32 0.03125, %v1988_v24 }
 0x9cd   : > { %v1998_v25 = vsub.f32 %v3488_v5, %v1995_v14 }
 0x9ce   : > { %v1991_v27 = vpop.xlane.xlu0 %1990 }
 0x9cf   : > { %v1996_v28 = vmul.f32 0.03125, %v1991_v27  ;;  %v2001_v30 = vmul.f32 %v1998_v25, %v1998_v25 }
 0x9d1   : > { %v1999_v19 = vsub.f32 %v3493_v13, %v1996_v28  ;;  %v2004_v31 = vsel %vm486_vm0, %v2001_v30, 0.0 }
 0x9d2   : > { %2005 = vadd.xlane.f32.xlu0 %v2004_v31  ;;  %v1994_v32 = vpop.xlane.xlu1 %1993 }
 0x9d3   : > { %v1997_v33 = vmul.f32 0.03125, %v1994_v32  ;;  %v2002_v53 = vmul.f32 %v1999_v19, %v1999_v19 }
 0x9d5   : > { %v2000_v56 = vsub.f32 %v3498_v21, %v1997_v33  ;;  %v2007_v34 = vsel %vm486_vm0, %v2002_v53, 0.0 }
 0x9d6   : > { %2008 = vadd.xlane.f32.xlu1 %v2007_v34 }
 0x9d7   : > { %v2003_v35 = vmul.f32 %v2000_v56, %v2000_v56 }
 0x9d9   : > { %v2010_v36 = vsel %vm486_vm0, %v2003_v35, 0.0 }
 0x9da   : > { %2011 = vadd.xlane.f32.xlu0 %v2010_v36 }
 0xa5b   : > { %v2006_v41 = vpop.xlane.xlu0 %2005 }
 0xa5c   : > { %v2013_v42 = vmul.f32 0.03125, %v2006_v41 }
 0xa5e   : > { %v2016_v43 = vadd.f32 1e-05, %v2013_v42  ;;  %v2426_v42 = vld [vmem:[%s3677_s13] ss:$0 sm:$0xff] }
 0xa5f   : > { %v2009_v44 = vpop.xlane.xlu1 %2008 }
 0xa60   : > { %2890 = vrsqrt.f32 %v2016_v43  ;;  %v2014_v45 = vmul.f32 0.03125, %v2009_v44 }
 0xa62   : > { %v2017_v46 = vadd.f32 1e-05, %v2014_v45 }
 0xa63   : > { %v2012_v47 = vpop.xlane.xlu0 %2011 }
 0xa64   : > { %2892 = vrsqrt.f32 %v2017_v46  ;;  %v2015_v48 = vmul.f32 0.03125, %v2012_v47 }
 0xa66   : > { %v2018_v49 = vadd.f32 1e-05, %v2015_v48 }
 0xa68   : > { %2894 = vrsqrt.f32 %v2018_v49 }
 0xa6d   : > { %v2891_v50 = vpop.eup %2890 }
 0xa6e   : > { %v2022_v51 = vmul.f32 %v2891_v50, %v1998_v25 }
 0xa70   : > { %v2031_v29 = vmul.f32 %v2420_v23, %v2022_v51 }
 0xa71   : > { %v2893_v52 = vpop.eup %2892 }
 0xa72   : > { %v2040_v54 = vadd.f32 %v2421_v26, %v2031_v29  ;;  %v2023_v55 = vmul.f32 %v2893_v52, %v1999_v19 }
 0xa74   : > { %2717 = vmatmul.mubr.msk.f32.vlgmr.msra.gmra.mxu1 %vm486_vm0, %v2040_v54  ;;  %v2032_v58 = vmul.f32 %v2420_v23, %v2023_v55 }
 0xa75   : > { %v2895_v62 = vpop.eup %2894  ;;  %2719 = vmatprep.mubr.msk.f32.mxu1 %vm3001_vm1, %v3000_v22 }
 0xa76   : > { %v2041_v63 = vadd.f32 %v2421_v26, %v2032_v58  ;;  %v2024_v0 = vmul.f32 %v2895_v62, %v2000_v56 }
 0xa78   : > { %2720 = vmatmul.mubr.msk.f32.gmra.mxu1 %vm486_vm0, %v2041_v63  ;;  %v2033_v1 = vmul.f32 %v2420_v23, %v2024_v0 }
 0xa79   : > { %2722 = vmatprep.mubr.msk.f32.mxu1 %vm3001_vm1, %v3000_v22 }
 0xa7a   : > { %v2042_v2 = vadd.f32 %v2421_v26, %v2033_v1 }
 0xa7c   : > { %2723 = vmatmul.mubr.msk.f32.gmra.mxu1 %vm486_vm0, %v2042_v2 }
 0xb34   : > { %v2129_v10 = vpop.f32.mrf.mxu1 }
 0xb35   : > { %v2130_v24 = vadd.f32 %v2422_v20, %v2129_v10 }
 0xb36   : > { %v2718_v14 = vpop.f32.mrf.mxu1 }
 0xb37   : > { %v2146_v25 = vmul.f32 0.70710677, %v2130_v24  ;;  %v2143_v34 = vmul.f32 0.5, %v2130_v24 }
 0xb38   : > { %v2134_v27 = vpop.f32.mrf.mxu1 }
 0xb39   : > { %2896 = verf.f32 %v2146_v25  ;;  %v2135_v28 = vadd.f32 %v2422_v20, %v2134_v27 }
 0xb3a   : > { %v2721_v30 = vpop.f32.mrf.mxu1 }
 0xb3b   : > { %v2147_v19 = vmul.f32 0.70710677, %v2135_v28  ;;  %v2144_v38 = vmul.f32 0.5, %v2135_v28 }
 0xb3c   : > { %v2139_v31 = vpop.f32.mrf.mxu1 }
 0xb3d   : > { %2898 = verf.f32 %v2147_v19  ;;  %v2140_v32 = vadd.f32 %v2422_v20, %v2139_v31 }
 0xb3e   : > { %v2724_v33 = vpop.f32.mrf.mxu1 }
 0xb3f   : > { %v2148_v53 = vmul.f32 0.70710677, %v2140_v32  ;;  %v2145_v57 = vmul.f32 0.5, %v2140_v32 }
 0xb41   : > { %2900 = verf.f32 %v2148_v53 }
 0xb46   : > { %v2897_v56 = vpop.eup %2896 }
 0xb47   : > { %v2152_v35 = vadd.f32 1.0, %v2897_v56 }
 0xb49   : > { %v2155_v36 = vmul.f32 %v2152_v35, %v2143_v34 }
 0xb4a   : > { %v2899_v37 = vpop.eup %2898 }
 0xb4b   : > { %2758 = vmatmul.mubr.f32.vlgmr.msra.gmra.mxu0 %v2155_v36  ;;  %v2153_v39 = vadd.f32 1.0, %v2899_v37 }
 0xb4c   : > { %2760 = vmatprep.mubr.msk.f32.mxu0 %vm3001_vm1, %v3000_v22 }
 0xb4d   : > { %v2156_v60 = vmul.f32 %v2153_v39, %v2144_v38 }
 0xb4e   : > { %v2901_v59 = vpop.eup %2900 }
 0xb4f   : > { %2761 = vmatmul.mubr.f32.gmra.mxu0 %v2156_v60  ;;  %v2154_v61 = vadd.f32 1.0, %v2901_v59 }
 0xb50   : > { %2763 = vmatprep.mubr.msk.f32.mxu0 %vm3001_vm1, %v3000_v22 }
 0xb51   : > { %v2157_v40 = vmul.f32 %v2154_v61, %v2145_v57 }
 0xb53   : > { %2764 = vmatmul.mubr.f32.gmra.mxu0 %v2157_v40 }
 0xc0b   : > { %v2240_v41 = vpop.f32.mrf.mxu0 }
 0xc0c   : > { %v2254_v43 = vadd.f32 %v2240_v41, %v3488_v5 }
 0xc0d   : > { %v2759_v44 = vpop.f32.mrf.mxu0 }
 0xc0e   : > { %v2264_v45 = vadd.f32 %v2426_v42, %v2254_v43 }
 0xc0f   : > { %v2245_v46 = vpop.f32.mrf.mxu0 }
 0xc10   : > { %2267 = vst.msk [vmem:[%s475_s22] sm:$0xff] %vm486_vm0, %v2264_v45  ;;  %v2255_v22 = vadd.f32 %v2245_v46, %v3493_v13 }
 0xc11   : > { %v2762_v47 = vpop.f32.mrf.mxu0 }
 0xc12   : > { %v2265_v48 = vadd.f32 %v2426_v42, %v2255_v22 }
 0xc13   : > { %v2250_v49 = vpop.f32.mrf.mxu0 }
 0xc14   : > { %2268 = vst.msk [vmem:[%s475_s22 + $0x8] sm:$0xff] %vm486_vm0, %v2265_v48  ;;  %v2256_v50 = vadd.f32 %v2250_v49, %v3498_v21 }
 0xc15   : > { %v2765_v5 = vpop.f32.mrf.mxu0 }
 0xc16   : > { %v2266_v23 = vadd.f32 %v2426_v42, %v2256_v50 }
 0xc18   : > { %2269 = vst.msk [vmem:[%s475_s22 + $0x10] sm:$0xff] %vm486_vm0, %v2266_v23 }
 0xc19   : > { %2944 = shalt.err (!%p2941_p0)
}
 0xc1a   : > { %s2945_s18 = scalar_lea.hbm %s3621_s27, 384  ;;  %s2949_s19 = scalar_lea.hbm %s3678_s14, 768 }
 0xc1b   : > { %p2946_p1 = scmp.ne.s32.totalorder %s3621_s27, %s2945_s18  ;;  %p2950_p4 = scmp.lt.s32.totalorder %s3621_s27, %s3678_s14 }
 0xc1c   : > { %p2951_p7 = scmp.lt.s32.totalorder %s2949_s19, %s2945_s18 }
 0xc1d   : > { %p2947_p2 = pnand %p2946_p1, %p3129_p5 }
 0xc1e   : > { %p2952_p8 = por %p2951_p7, %p2950_p4 }
 0xc1f   : > { %p2948_p3 = pneg %p2947_p2 }
 0xc21   : > { %p2953_p6 = pnand %p2952_p8, %p2948_p3 }
 0xc23   : > { %2956 = shalt.err (!%p2953_p6)
}
 0xc24   : > { %s3014_s0 = smov 128   ;;  %s3015_s20 = smov 8  }
 0xc25   : > { %2773 = dma.vmem_to_hbm [thread:$0]  (%p3129_p5), %s3616_s28, 384, %s3621_s27, %s3624_s17, %s3014_s0, %s3014_s0, %s3015_s20  }
 0xc26 PF: > { %p2785_p9 = scmp.ge.s32.totalorder %s2995_s16, 2  ;;  %s2299_s26 = sand.u32 1, %s2983_s29  }
 0xc27   : > { %p3690_p10 = scmp.ne.s32.totalorder %s3687_s24, 0  ;;  %s2300_s18 = scalar_lea.sflag [#allocation4], %s2299_s26 }
 0xc29   : > { %p2780_p11 = pnand %p2785_p9, %p3690_p10 }
 0xc2b   : > { %p2781_p12 = pneg %p2780_p11 }
 0xc2d   : > { %2978 = dma.done.wait (%p2781_p12), %s2300_s18, 384  }
 0xc2e   : > { %2980 = vsyncadd (%p2781_p12), %s2300_s18, 4294966912  ;;  %s3691_s16 = sld [smem:[#allocation9_spill]]  ;;  %s3694_s29 = smov %s2987_s30 }
 0xc2f   : > { %s3692_s22 = sld [smem:[#allocation8_spill]] }
 0xc30   : > { %s3693_s15 = sld [smem:[#allocation10_spill]] }
 0xc34   : > { %p25_p13 = scmp.ge.s32.totalorder %s3691_s16, 4  }
 0xc35   : > { %s3695_s30 = smov %s3692_s22 }
 0xc36   :  { %27 = sbr.rel (!%p25_p13) target bundleno = 6 (0x6), region = 116 }
 0xc3b   :  { %2305 = vsyncpa [#allocation3], 1 }
 0xc3c   :  { %2307 = vsyncpa [#allocation3 + $0x1], 1 }
 0xc3d   :  { %2308 = vsyncpa [#allocation4], 1 }
 0xc3e   :  { %2310 = vsyncpa [#allocation4 + $0x1], 1 }

</bundles_post_ra>
